<compile_context>
chip_gen: v5e
topology: v5e:2x2
jax: 0.10.0
libtpu: 0.0.40
codegen_flags: <defaults>
</compile_context>

<pallas_src>
import math

import jax
import jax.numpy as jnp
from jax.experimental import pallas as pl
from jax.experimental.pallas import tpu as pltpu

# ---- model dimensions (small, synthetic) -----------------------------------
B, S, D = 2, 8, 32          # batch, seq (bag instances), model dim (layer.size)
H = 4                       # attention heads
DK = D // H                 # per-head dim
DFF = 64                    # feed-forward hidden dim
N_LAYERS = 2                # N in Encoder(layer, N)
EPS = 1e-5                  # nn.LayerNorm default eps
BS = B * S

# per-layer parameter order used inside the kernel (QKV already fused)
_PARAM_NAMES = ('wqkv', 'bqkv', 'wo', 'bo', 'ln1g', 'ln1b', 'ln2g', 'ln2b',
                'w1', 'b1', 'w2', 'b2')
_N_PARAMS = len(_PARAM_NAMES)


def _layernorm(x, g, b):
    """PyTorch nn.LayerNorm over the last dim (biased variance)."""
    mean = jnp.mean(x, axis=-1, keepdims=True)
    var = jnp.mean(jnp.square(x - mean), axis=-1, keepdims=True)
    return (x - mean) * jax.lax.rsqrt(var + EPS) * g + b


# ---------------------------------------------------------------------------
# Single fused kernel: N_LAYERS x (pre-norm MHSA + residual, pre-norm FFN +
# residual) + final LayerNorm.  Whole problem fits in VMEM -> no grid.
# ---------------------------------------------------------------------------
def encoder_kernel(*refs):
    x_ref = refs[0]
    layer_refs = refs[1:1 + N_LAYERS * _N_PARAMS]
    normg_ref = refs[1 + N_LAYERS * _N_PARAMS]
    normb_ref = refs[2 + N_LAYERS * _N_PARAMS]
    xout_ref, attn_ref = refs[3 + N_LAYERS * _N_PARAMS:]

    x = x_ref[...]                                            # [B*S, D] f32
    scale = 1.0 / math.sqrt(DK)

    for li in range(N_LAYERS):                                # static unroll
        (wqkv, bqkv, wo, bo, ln1g, ln1b, ln2g, ln2b,
         w1, b1, w2, b2) = (r[...] for r in
                            layer_refs[li * _N_PARAMS:(li + 1) * _N_PARAMS])

        # ----- sublayer 1: x + SelfAttn(LayerNorm(x)) -----
        xn = _layernorm(x, ln1g, ln1b)                        # [BS, D]
        qkv = jnp.dot(xn, wqkv,
                      preferred_element_type=jnp.float32) + bqkv   # [BS, 3D]
        qkv = qkv.reshape(B, S, 3 * D)                        # leading-dim split

        p_parts = []
        ctx_parts = []
        for h in range(H):                                    # unrolled, H tiny
            qh = qkv[:, :, h * DK:(h + 1) * DK]               # [B, S, DK]
            kh = qkv[:, :, D + h * DK:D + (h + 1) * DK]
            vh = qkv[:, :, 2 * D + h * DK:2 * D + (h + 1) * DK]
            s = jnp.einsum('bqd,bkd->bqk', qh, kh,
                           preferred_element_type=jnp.float32) * scale
            s = s - jnp.max(s, axis=-1, keepdims=True)        # stable softmax
            e = jnp.exp(s)
            inv = pl.reciprocal(jnp.sum(e, axis=-1, keepdims=True), approx=True)
            p = e * inv                                       # [B, S, S]
            p_parts.append(p)
            ctx_parts.append(jnp.einsum('bqk,bkd->bqd', p, vh,
                                        preferred_element_type=jnp.float32))

        if li == N_LAYERS - 1:
            # one contiguous store; wrapper reshapes to [B, H, S, S]
            attn_ref[...] = jnp.concatenate(p_parts, axis=-1)  # [B, S, H*S]

        ctx = jnp.concatenate(ctx_parts, axis=-1).reshape(BS, D)
        x = x + jnp.dot(ctx, wo, preferred_element_type=jnp.float32) + bo

        # ----- sublayer 2: x + FFN(LayerNorm(x)) -----
        xn2 = _layernorm(x, ln2g, ln2b)
        h1 = jnp.maximum(
            jnp.dot(xn2, w1, preferred_element_type=jnp.float32) + b1, 0.0)
        x = x + jnp.dot(h1, w2, preferred_element_type=jnp.float32) + b2

    # ----- final Encoder LayerNorm -----
    xout_ref[...] = _layernorm(x, normg_ref[...], normb_ref[...])


_VMEM = pl.BlockSpec(memory_space=pltpu.MemorySpace.VMEM)


def _cost_estimate():
    per_layer_flops = (2 * BS * D * 3 * D        # fused QKV projection
                       + 2 * B * H * S * S * DK  # scores
                       + 2 * B * H * S * S * DK  # context
                       + 2 * BS * D * D          # output projection
                       + 2 * BS * D * DFF * 2)   # FFN
    flops = N_LAYERS * per_layer_flops
    transcendentals = N_LAYERS * (B * H * S * S        # exp
                                  + B * H * S          # reciprocal
                                  + 2 * BS) + BS       # rsqrt (2 LN/layer + final)
    return flops, transcendentals


def encoder_forward(x, c, layer_params, norm_g, norm_b):
    """Pallas equivalent of Encoder.forward(x, c).

    layer_params: list of N_LAYERS per-layer parameter dicts (the PyTorch
    clones share values at initialization but are independent parameters).
    """
    del c  # TODO(synk): `c` is consumed inside the unspecified snuffy layer; ignored here.
    assert len(layer_params) == N_LAYERS

    # Fuse Q/K/V weights into one [D, 3D] matmul per layer (free, outside kernel).
    flat_params = []
    for p in layer_params:
        fused = dict(p)
        fused['wqkv'] = jnp.concatenate([p['wq'], p['wk'], p['wv']], axis=1)
        fused['bqkv'] = jnp.concatenate([p['bq'], p['bk'], p['bv']], axis=1)
        flat_params += [fused[n] for n in _PARAM_NAMES]

    inputs = [x.reshape(BS, D)] + flat_params + [norm_g, norm_b]

    flops, transcendentals = _cost_estimate()
    bytes_accessed = sum(int(a.size) * 4 for a in inputs) + (BS * D + B * S * H * S) * 4

    out_flat, attn_flat = pl.pallas_call(
        encoder_kernel,
        out_shape=(jax.ShapeDtypeStruct((BS, D), jnp.float32),
                   jax.ShapeDtypeStruct((B, S, H * S), jnp.float32)),
        in_specs=[_VMEM] * len(inputs),
        out_specs=(_VMEM, _VMEM),
        cost_estimate=pl.CostEstimate(flops=flops,
                                      transcendentals=transcendentals,
                                      bytes_accessed=bytes_accessed),
    )(*inputs)

    out = out_flat.reshape(B, S, D)
    # free layout plumbing in the wrapper: [B, S, H*S] -> [B, H, S, S]
    attn = attn_flat.reshape(B, S, H, S).transpose(0, 2, 1, 3)
    return out, attn


# ---------------------------------------------------------------------------
# Pure-JAX reference (for correctness check) and deterministic param creation.
# 1-D params are stored as (1, dim) for TPU-friendly 2-D layouts.
# ---------------------------------------------------------------------------
def encoder_reference(x, layer_params, norm_g, norm_b):
    def ln(v, g, b):
        m = jnp.mean(v, -1, keepdims=True)
        var = jnp.mean((v - m) ** 2, -1, keepdims=True)
        return (v - m) / jnp.sqrt(var + EPS) * g + b

    attn = None
    for p in layer_params:
        xn = ln(x, p['ln1g'], p['ln1b'])
        q = (xn @ p['wq'] + p['bq']).reshape(B, S, H, DK).transpose(0, 2, 1, 3)
        k = (xn @ p['wk'] + p['bk']).reshape(B, S, H, DK).transpose(0, 2, 1, 3)
        v = (xn @ p['wv'] + p['bv']).reshape(B, S, H, DK).transpose(0, 2, 1, 3)
        s = jnp.einsum('bhqd,bhkd->bhqk', q, k) / math.sqrt(DK)
        attn = jax.nn.softmax(s, axis=-1)
        ctx = jnp.einsum('bhqk,bhkd->bhqd', attn, v).transpose(0, 2, 1, 3).reshape(B, S, D)
        x = x + ctx @ p['wo'] + p['bo']
        xn2 = ln(x, p['ln2g'], p['ln2b'])
        x = x + jnp.maximum(xn2 @ p['w1'] + p['b1'], 0.0) @ p['w2'] + p['b2']
    return ln(x, norm_g, norm_b), attn


def make_layer_params(key):
    ks = jax.random.split(key, 12)

    def w(k, din, dout):
        lim = 1.0 / math.sqrt(din)
        return jax.random.uniform(k, (din, dout), jnp.float32, -lim, lim)

    def bvec(k, din, dout):
        lim = 1.0 / math.sqrt(din)
        return jax.random.uniform(k, (1, dout), jnp.float32, -lim, lim)

    return {
        'wq': w(ks[0], D, D), 'bq': bvec(ks[1], D, D),
        'wk': w(ks[2], D, D), 'bk': bvec(ks[3], D, D),
        'wv': w(ks[4], D, D), 'bv': bvec(ks[5], D, D),
        'wo': w(ks[6], D, D), 'bo': bvec(ks[7], D, D),
        'ln1g': jnp.ones((1, D), jnp.float32), 'ln1b': jnp.zeros((1, D), jnp.float32),
        'ln2g': jnp.ones((1, D), jnp.float32), 'ln2b': jnp.zeros((1, D), jnp.float32),
        'w1': w(ks[8], D, DFF), 'b1': bvec(ks[9], D, DFF),
        'w2': w(ks[10], DFF, D), 'b2': bvec(ks[11], DFF, D),
    }


if __name__ == "__main__":
    key = jax.random.PRNGKey(0)
    kx, *kls = jax.random.split(key, N_LAYERS + 1)
    x = jax.random.normal(kx, (B, S, D), jnp.float32)
    # distinct per-layer params (clones share values only at init; trained
    # snuffy models have independent weights per layer)
    layer_params = [make_layer_params(k) for k in kls]
    norm_g = jnp.ones((1, D), jnp.float32)
    norm_b = jnp.zeros((1, D), jnp.float32)
    c = 2  # unused (see TODO above)

    fwd = jax.jit(encoder_forward)
    out, attn = fwd(x, c, layer_params, norm_g, norm_b)
    jax.block_until_ready((out, attn))

    ref_out, ref_attn = encoder_reference(x, layer_params, norm_g, norm_b)

    assert out.shape == (B, S, D) and attn.shape == (B, H, S, S)
    assert bool(jnp.all(jnp.isfinite(out))) and bool(jnp.all(jnp.isfinite(attn)))
    assert bool(jnp.allclose(out, ref_out, atol=5e-2, rtol=5e-2))
    assert bool(jnp.allclose(attn, ref_attn, atol=5e-2, rtol=5e-2))
    print("KERNEL_OK")
</pallas_src>

<mosaic_0001>
module attributes {stable_mosaic.version = 11 : i64} {
  func.func @encoder_kernel(%arg0: memref<16x32xf32, #tpu.memory_space<vmem>>, %arg1: memref<32x96xf32, #tpu.memory_space<vmem>>, %arg2: memref<1x96xf32, #tpu.memory_space<vmem>>, %arg3: memref<32x32xf32, #tpu.memory_space<vmem>>, %arg4: memref<1x32xf32, #tpu.memory_space<vmem>>, %arg5: memref<1x32xf32, #tpu.memory_space<vmem>>, %arg6: memref<1x32xf32, #tpu.memory_space<vmem>>, %arg7: memref<1x32xf32, #tpu.memory_space<vmem>>, %arg8: memref<1x32xf32, #tpu.memory_space<vmem>>, %arg9: memref<32x64xf32, #tpu.memory_space<vmem>>, %arg10: memref<1x64xf32, #tpu.memory_space<vmem>>, %arg11: memref<64x32xf32, #tpu.memory_space<vmem>>, %arg12: memref<1x32xf32, #tpu.memory_space<vmem>>, %arg13: memref<32x96xf32, #tpu.memory_space<vmem>>, %arg14: memref<1x96xf32, #tpu.memory_space<vmem>>, %arg15: memref<32x32xf32, #tpu.memory_space<vmem>>, %arg16: memref<1x32xf32, #tpu.memory_space<vmem>>, %arg17: memref<1x32xf32, #tpu.memory_space<vmem>>, %arg18: memref<1x32xf32, #tpu.memory_space<vmem>>, %arg19: memref<1x32xf32, #tpu.memory_space<vmem>>, %arg20: memref<1x32xf32, #tpu.memory_space<vmem>>, %arg21: memref<32x64xf32, #tpu.memory_space<vmem>>, %arg22: memref<1x64xf32, #tpu.memory_space<vmem>>, %arg23: memref<64x32xf32, #tpu.memory_space<vmem>>, %arg24: memref<1x32xf32, #tpu.memory_space<vmem>>, %arg25: memref<1x32xf32, #tpu.memory_space<vmem>>, %arg26: memref<1x32xf32, #tpu.memory_space<vmem>>, %arg27: memref<16x32xf32, #tpu.memory_space<vmem>>, %arg28: memref<2x8x32xf32, #tpu.memory_space<vmem>>) attributes {dimension_semantics = [], scalar_prefetch = 0 : i64, scratch_operands = 0 : i64, tpu.core_type = #tpu.core_type<tc>} {
    %c0 = arith.constant 0 : index
    %c0_0 = arith.constant 0 : index
    %0 = vector.load %arg0[%c0, %c0_0] : memref<16x32xf32, #tpu.memory_space<vmem>>, vector<16x32xf32>
    %c0_1 = arith.constant 0 : index
    %c0_2 = arith.constant 0 : index
    %1 = vector.load %arg1[%c0_1, %c0_2] : memref<32x96xf32, #tpu.memory_space<vmem>>, vector<32x96xf32>
    %c0_3 = arith.constant 0 : index
    %c0_4 = arith.constant 0 : index
    %2 = vector.load %arg2[%c0_3, %c0_4] : memref<1x96xf32, #tpu.memory_space<vmem>>, vector<1x96xf32>
    %c0_5 = arith.constant 0 : index
    %c0_6 = arith.constant 0 : index
    %3 = vector.load %arg3[%c0_5, %c0_6] : memref<32x32xf32, #tpu.memory_space<vmem>>, vector<32x32xf32>
    %c0_7 = arith.constant 0 : index
    %c0_8 = arith.constant 0 : index
    %4 = vector.load %arg4[%c0_7, %c0_8] : memref<1x32xf32, #tpu.memory_space<vmem>>, vector<1x32xf32>
    %c0_9 = arith.constant 0 : index
    %c0_10 = arith.constant 0 : index
    %5 = vector.load %arg5[%c0_9, %c0_10] : memref<1x32xf32, #tpu.memory_space<vmem>>, vector<1x32xf32>
    %c0_11 = arith.constant 0 : index
    %c0_12 = arith.constant 0 : index
    %6 = vector.load %arg6[%c0_11, %c0_12] : memref<1x32xf32, #tpu.memory_space<vmem>>, vector<1x32xf32>
    %c0_13 = arith.constant 0 : index
    %c0_14 = arith.constant 0 : index
    %7 = vector.load %arg7[%c0_13, %c0_14] : memref<1x32xf32, #tpu.memory_space<vmem>>, vector<1x32xf32>
    %c0_15 = arith.constant 0 : index
    %c0_16 = arith.constant 0 : index
    %8 = vector.load %arg8[%c0_15, %c0_16] : memref<1x32xf32, #tpu.memory_space<vmem>>, vector<1x32xf32>
    %c0_17 = arith.constant 0 : index
    %c0_18 = arith.constant 0 : index
    %9 = vector.load %arg9[%c0_17, %c0_18] : memref<32x64xf32, #tpu.memory_space<vmem>>, vector<32x64xf32>
    %c0_19 = arith.constant 0 : index
    %c0_20 = arith.constant 0 : index
    %10 = vector.load %arg10[%c0_19, %c0_20] : memref<1x64xf32, #tpu.memory_space<vmem>>, vector<1x64xf32>
    %c0_21 = arith.constant 0 : index
    %c0_22 = arith.constant 0 : index
    %11 = vector.load %arg11[%c0_21, %c0_22] : memref<64x32xf32, #tpu.memory_space<vmem>>, vector<64x32xf32>
    %c0_23 = arith.constant 0 : index
    %c0_24 = arith.constant 0 : index
    %12 = vector.load %arg12[%c0_23, %c0_24] : memref<1x32xf32, #tpu.memory_space<vmem>>, vector<1x32xf32>
    %cst = arith.constant dense<0.000000e+00> : vector<16xf32>
    %13 = vector.multi_reduction <add>, %0, %cst [1] : vector<16x32xf32> to vector<16xf32>
    %14 = vector.shape_cast %13 : vector<16xf32> to vector<16x1xf32>
    %cst_25 = arith.constant 3.200000e+01 : f32
    %15 = vector.broadcast %cst_25 : f32 to vector<16x1xf32>
    %16 = arith.divf %14, %15 : vector<16x1xf32>
    %17 = vector.broadcast %16 : vector<16x1xf32> to vector<16x32xf32>
    %18 = arith.subf %0, %17 : vector<16x32xf32>
    %19 = arith.mulf %18, %18 : vector<16x32xf32>
    %cst_26 = arith.constant dense<0.000000e+00> : vector<16xf32>
    %20 = vector.multi_reduction <add>, %19, %cst_26 [1] : vector<16x32xf32> to vector<16xf32>
    %21 = vector.shape_cast %20 : vector<16xf32> to vector<16x1xf32>
    %cst_27 = arith.constant 3.200000e+01 : f32
    %22 = vector.broadcast %cst_27 : f32 to vector<16x1xf32>
    %23 = arith.divf %21, %22 : vector<16x1xf32>
    %24 = vector.broadcast %16 : vector<16x1xf32> to vector<16x32xf32>
    %25 = arith.subf %0, %24 : vector<16x32xf32>
    %cst_28 = arith.constant 9.99999974E-6 : f32
    %26 = vector.broadcast %cst_28 : f32 to vector<16x1xf32>
    %27 = arith.addf %23, %26 : vector<16x1xf32>
    %28 = math.rsqrt %27 : vector<16x1xf32>
    %29 = vector.broadcast %28 : vector<16x1xf32> to vector<16x32xf32>
    %30 = arith.mulf %25, %29 : vector<16x32xf32>
    %31 = vector.broadcast %5 : vector<1x32xf32> to vector<16x32xf32>
    %32 = arith.mulf %30, %31 : vector<16x32xf32>
    %33 = vector.broadcast %6 : vector<1x32xf32> to vector<16x32xf32>
    %34 = arith.addf %32, %33 : vector<16x32xf32>
    %cst_29 = arith.constant dense<0.000000e+00> : vector<16x96xf32>
    %35 = tpu.matmul %34, %1, %cst_29 {dimension_numbers = #tpu.dot_dimension_numbers<[1], [0], [0], [1], [0, 0, 1, 1], [], []>} : vector<16x32xf32>, vector<32x96xf32>, vector<16x96xf32> -> vector<16x96xf32>
    %36 = vector.broadcast %2 : vector<1x96xf32> to vector<16x96xf32>
    %37 = arith.addf %35, %36 : vector<16x96xf32>
    %38 = vector.shape_cast %37 : vector<16x96xf32> to vector<2x8x96xf32>
    %39 = vector.extract_strided_slice %38 {offsets = [0, 0, 0], sizes = [2, 8, 8], strides = [1, 1, 1]} : vector<2x8x96xf32> to vector<2x8x8xf32>
    %40 = vector.extract_strided_slice %38 {offsets = [0, 0, 32], sizes = [2, 8, 8], strides = [1, 1, 1]} : vector<2x8x96xf32> to vector<2x8x8xf32>
    %41 = vector.extract_strided_slice %38 {offsets = [0, 0, 64], sizes = [2, 8, 8], strides = [1, 1, 1]} : vector<2x8x96xf32> to vector<2x8x8xf32>
    "tpu.trace_start"() <{level = 10 : i32, message = "bqd,bkd->bqk"}> : () -> ()
    %cst_30 = arith.constant dense<0.000000e+00> : vector<2x8x8xf32>
    %42 = tpu.matmul %39, %40, %cst_30 {dimension_numbers = #tpu.dot_dimension_numbers<[2], [2], [1], [1], [0, 0, 0, 1, 1, 1], [0], [0]>} : vector<2x8x8xf32>, vector<2x8x8xf32>, vector<2x8x8xf32> -> vector<2x8x8xf32>
    "tpu.trace_stop"() : () -> ()
    %cst_31 = arith.constant 0.353553385 : f32
    %43 = vector.broadcast %cst_31 : f32 to vector<2x8x8xf32>
    %44 = arith.mulf %42, %43 : vector<2x8x8xf32>
    %cst_32 = arith.constant dense<0xFF800000> : vector<2x8xf32>
    %45 = vector.multi_reduction <maximumf>, %44, %cst_32 [2] : vector<2x8x8xf32> to vector<2x8xf32>
    %46 = vector.shape_cast %45 : vector<2x8xf32> to vector<2x8x1xf32>
    %47 = vector.broadcast %46 : vector<2x8x1xf32> to vector<2x8x8xf32>
    %48 = arith.subf %44, %47 : vector<2x8x8xf32>
    %49 = math.exp %48 : vector<2x8x8xf32>
    %cst_33 = arith.constant dense<0.000000e+00> : vector<2x8xf32>
    %50 = vector.multi_reduction <add>, %49, %cst_33 [2] : vector<2x8x8xf32> to vector<2x8xf32>
    %51 = vector.shape_cast %50 : vector<2x8xf32> to vector<2x8x1xf32>
    %52 = tpu.reciprocal %51 {approx = true} : vector<2x8x1xf32> -> vector<2x8x1xf32>
    %53 = vector.broadcast %52 : vector<2x8x1xf32> to vector<2x8x8xf32>
    %54 = arith.mulf %49, %53 : vector<2x8x8xf32>
    "tpu.trace_start"() <{level = 10 : i32, message = "bqk,bkd->bqd"}> : () -> ()
    %cst_34 = arith.constant dense<0.000000e+00> : vector<2x8x8xf32>
    %55 = tpu.matmul %54, %41, %cst_34 {dimension_numbers = #tpu.dot_dimension_numbers<[2], [1], [1], [2], [0, 0, 0, 1, 1, 2], [0], [0]>} : vector<2x8x8xf32>, vector<2x8x8xf32>, vector<2x8x8xf32> -> vector<2x8x8xf32>
    "tpu.trace_stop"() : () -> ()
    %56 = vector.extract_strided_slice %38 {offsets = [0, 0, 8], sizes = [2, 8, 8], strides = [1, 1, 1]} : vector<2x8x96xf32> to vector<2x8x8xf32>
    %57 = vector.extract_strided_slice %38 {offsets = [0, 0, 40], sizes = [2, 8, 8], strides = [1, 1, 1]} : vector<2x8x96xf32> to vector<2x8x8xf32>
    %58 = vector.extract_strided_slice %38 {offsets = [0, 0, 72], sizes = [2, 8, 8], strides = [1, 1, 1]} : vector<2x8x96xf32> to vector<2x8x8xf32>
    "tpu.trace_start"() <{level = 10 : i32, message = "bqd,bkd->bqk"}> : () -> ()
    %cst_35 = arith.constant dense<0.000000e+00> : vector<2x8x8xf32>
    %59 = tpu.matmul %56, %57, %cst_35 {dimension_numbers = #tpu.dot_dimension_numbers<[2], [2], [1], [1], [0, 0, 0, 1, 1, 1], [0], [0]>} : vector<2x8x8xf32>, vector<2x8x8xf32>, vector<2x8x8xf32> -> vector<2x8x8xf32>
    "tpu.trace_stop"() : () -> ()
    %cst_36 = arith.constant 0.353553385 : f32
    %60 = vector.broadcast %cst_36 : f32 to vector<2x8x8xf32>
    %61 = arith.mulf %59, %60 : vector<2x8x8xf32>
    %cst_37 = arith.constant dense<0xFF800000> : vector<2x8xf32>
    %62 = vector.multi_reduction <maximumf>, %61, %cst_37 [2] : vector<2x8x8xf32> to vector<2x8xf32>
    %63 = vector.shape_cast %62 : vector<2x8xf32> to vector<2x8x1xf32>
    %64 = vector.broadcast %63 : vector<2x8x1xf32> to vector<2x8x8xf32>
    %65 = arith.subf %61, %64 : vector<2x8x8xf32>
    %66 = math.exp %65 : vector<2x8x8xf32>
    %cst_38 = arith.constant dense<0.000000e+00> : vector<2x8xf32>
    %67 = vector.multi_reduction <add>, %66, %cst_38 [2] : vector<2x8x8xf32> to vector<2x8xf32>
    %68 = vector.shape_cast %67 : vector<2x8xf32> to vector<2x8x1xf32>
    %69 = tpu.reciprocal %68 {approx = true} : vector<2x8x1xf32> -> vector<2x8x1xf32>
    %70 = vector.broadcast %69 : vector<2x8x1xf32> to vector<2x8x8xf32>
    %71 = arith.mulf %66, %70 : vector<2x8x8xf32>
    "tpu.trace_start"() <{level = 10 : i32, message = "bqk,bkd->bqd"}> : () -> ()
    %cst_39 = arith.constant dense<0.000000e+00> : vector<2x8x8xf32>
    %72 = tpu.matmul %71, %58, %cst_39 {dimension_numbers = #tpu.dot_dimension_numbers<[2], [1], [1], [2], [0, 0, 0, 1, 1, 2], [0], [0]>} : vector<2x8x8xf32>, vector<2x8x8xf32>, vector<2x8x8xf32> -> vector<2x8x8xf32>
    "tpu.trace_stop"() : () -> ()
    %73 = vector.extract_strided_slice %38 {offsets = [0, 0, 16], sizes = [2, 8, 8], strides = [1, 1, 1]} : vector<2x8x96xf32> to vector<2x8x8xf32>
    %74 = vector.extract_strided_slice %38 {offsets = [0, 0, 48], sizes = [2, 8, 8], strides = [1, 1, 1]} : vector<2x8x96xf32> to vector<2x8x8xf32>
    %75 = vector.extract_strided_slice %38 {offsets = [0, 0, 80], sizes = [2, 8, 8], strides = [1, 1, 1]} : vector<2x8x96xf32> to vector<2x8x8xf32>
    "tpu.trace_start"() <{level = 10 : i32, message = "bqd,bkd->bqk"}> : () -> ()
    %cst_40 = arith.constant dense<0.000000e+00> : vector<2x8x8xf32>
    %76 = tpu.matmul %73, %74, %cst_40 {dimension_numbers = #tpu.dot_dimension_numbers<[2], [2], [1], [1], [0, 0, 0, 1, 1, 1], [0], [0]>} : vector<2x8x8xf32>, vector<2x8x8xf32>, vector<2x8x8xf32> -> vector<2x8x8xf32>
    "tpu.trace_stop"() : () -> ()
    %cst_41 = arith.constant 0.353553385 : f32
    %77 = vector.broadcast %cst_41 : f32 to vector<2x8x8xf32>
    %78 = arith.mulf %76, %77 : vector<2x8x8xf32>
    %cst_42 = arith.constant dense<0xFF800000> : vector<2x8xf32>
    %79 = vector.multi_reduction <maximumf>, %78, %cst_42 [2] : vector<2x8x8xf32> to vector<2x8xf32>
    %80 = vector.shape_cast %79 : vector<2x8xf32> to vector<2x8x1xf32>
    %81 = vector.broadcast %80 : vector<2x8x1xf32> to vector<2x8x8xf32>
    %82 = arith.subf %78, %81 : vector<2x8x8xf32>
    %83 = math.exp %82 : vector<2x8x8xf32>
    %cst_43 = arith.constant dense<0.000000e+00> : vector<2x8xf32>
    %84 = vector.multi_reduction <add>, %83, %cst_43 [2] : vector<2x8x8xf32> to vector<2x8xf32>
    %85 = vector.shape_cast %84 : vector<2x8xf32> to vector<2x8x1xf32>
    %86 = tpu.reciprocal %85 {approx = true} : vector<2x8x1xf32> -> vector<2x8x1xf32>
    %87 = vector.broadcast %86 : vector<2x8x1xf32> to vector<2x8x8xf32>
    %88 = arith.mulf %83, %87 : vector<2x8x8xf32>
    "tpu.trace_start"() <{level = 10 : i32, message = "bqk,bkd->bqd"}> : () -> ()
    %cst_44 = arith.constant dense<0.000000e+00> : vector<2x8x8xf32>
    %89 = tpu.matmul %88, %75, %cst_44 {dimension_numbers = #tpu.dot_dimension_numbers<[2], [1], [1], [2], [0, 0, 0, 1, 1, 2], [0], [0]>} : vector<2x8x8xf32>, vector<2x8x8xf32>, vector<2x8x8xf32> -> vector<2x8x8xf32>
    "tpu.trace_stop"() : () -> ()
    %90 = vector.extract_strided_slice %38 {offsets = [0, 0, 24], sizes = [2, 8, 8], strides = [1, 1, 1]} : vector<2x8x96xf32> to vector<2x8x8xf32>
    %91 = vector.extract_strided_slice %38 {offsets = [0, 0, 56], sizes = [2, 8, 8], strides = [1, 1, 1]} : vector<2x8x96xf32> to vector<2x8x8xf32>
    %92 = vector.extract_strided_slice %38 {offsets = [0, 0, 88], sizes = [2, 8, 8], strides = [1, 1, 1]} : vector<2x8x96xf32> to vector<2x8x8xf32>
    "tpu.trace_start"() <{level = 10 : i32, message = "bqd,bkd->bqk"}> : () -> ()
    %cst_45 = arith.constant dense<0.000000e+00> : vector<2x8x8xf32>
    %93 = tpu.matmul %90, %91, %cst_45 {dimension_numbers = #tpu.dot_dimension_numbers<[2], [2], [1], [1], [0, 0, 0, 1, 1, 1], [0], [0]>} : vector<2x8x8xf32>, vector<2x8x8xf32>, vector<2x8x8xf32> -> vector<2x8x8xf32>
    "tpu.trace_stop"() : () -> ()
    %cst_46 = arith.constant 0.353553385 : f32
    %94 = vector.broadcast %cst_46 : f32 to vector<2x8x8xf32>
    %95 = arith.mulf %93, %94 : vector<2x8x8xf32>
    %cst_47 = arith.constant dense<0xFF800000> : vector<2x8xf32>
    %96 = vector.multi_reduction <maximumf>, %95, %cst_47 [2] : vector<2x8x8xf32> to vector<2x8xf32>
    %97 = vector.shape_cast %96 : vector<2x8xf32> to vector<2x8x1xf32>
    %98 = vector.broadcast %97 : vector<2x8x1xf32> to vector<2x8x8xf32>
    %99 = arith.subf %95, %98 : vector<2x8x8xf32>
    %100 = math.exp %99 : vector<2x8x8xf32>
    %cst_48 = arith.constant dense<0.000000e+00> : vector<2x8xf32>
    %101 = vector.multi_reduction <add>, %100, %cst_48 [2] : vector<2x8x8xf32> to vector<2x8xf32>
    %102 = vector.shape_cast %101 : vector<2x8xf32> to vector<2x8x1xf32>
    %103 = tpu.reciprocal %102 {approx = true} : vector<2x8x1xf32> -> vector<2x8x1xf32>
    %104 = vector.broadcast %103 : vector<2x8x1xf32> to vector<2x8x8xf32>
    %105 = arith.mulf %100, %104 : vector<2x8x8xf32>
    "tpu.trace_start"() <{level = 10 : i32, message = "bqk,bkd->bqd"}> : () -> ()
    %cst_49 = arith.constant dense<0.000000e+00> : vector<2x8x8xf32>
    %106 = tpu.matmul %105, %92, %cst_49 {dimension_numbers = #tpu.dot_dimension_numbers<[2], [1], [1], [2], [0, 0, 0, 1, 1, 2], [0], [0]>} : vector<2x8x8xf32>, vector<2x8x8xf32>, vector<2x8x8xf32> -> vector<2x8x8xf32>
    "tpu.trace_stop"() : () -> ()
    %107 = tpu.concatenate %55, %72, %89, %106 in 2 : vector<2x8x8xf32>, vector<2x8x8xf32>, vector<2x8x8xf32>, vector<2x8x8xf32> -> vector<2x8x32xf32>
    %108 = vector.shape_cast %107 : vector<2x8x32xf32> to vector<16x32xf32>
    %cst_50 = arith.constant dense<0.000000e+00> : vector<16x32xf32>
    %109 = tpu.matmul %108, %3, %cst_50 {dimension_numbers = #tpu.dot_dimension_numbers<[1], [0], [0], [1], [0, 0, 1, 1], [], []>} : vector<16x32xf32>, vector<32x32xf32>, vector<16x32xf32> -> vector<16x32xf32>
    %110 = arith.addf %0, %109 : vector<16x32xf32>
    %111 = vector.broadcast %4 : vector<1x32xf32> to vector<16x32xf32>
    %112 = arith.addf %110, %111 : vector<16x32xf32>
    %cst_51 = arith.constant dense<0.000000e+00> : vector<16xf32>
    %113 = vector.multi_reduction <add>, %112, %cst_51 [1] : vector<16x32xf32> to vector<16xf32>
    %114 = vector.shape_cast %113 : vector<16xf32> to vector<16x1xf32>
    %cst_52 = arith.constant 3.200000e+01 : f32
    %115 = vector.broadcast %cst_52 : f32 to vector<16x1xf32>
    %116 = arith.divf %114, %115 : vector<16x1xf32>
    %117 = vector.broadcast %116 : vector<16x1xf32> to vector<16x32xf32>
    %118 = arith.subf %112, %117 : vector<16x32xf32>
    %119 = arith.mulf %118, %118 : vector<16x32xf32>
    %cst_53 = arith.constant dense<0.000000e+00> : vector<16xf32>
    %120 = vector.multi_reduction <add>, %119, %cst_53 [1] : vector<16x32xf32> to vector<16xf32>
    %121 = vector.shape_cast %120 : vector<16xf32> to vector<16x1xf32>
    %cst_54 = arith.constant 3.200000e+01 : f32
    %122 = vector.broadcast %cst_54 : f32 to vector<16x1xf32>
    %123 = arith.divf %121, %122 : vector<16x1xf32>
    %124 = vector.broadcast %116 : vector<16x1xf32> to vector<16x32xf32>
    %125 = arith.subf %112, %124 : vector<16x32xf32>
    %cst_55 = arith.constant 9.99999974E-6 : f32
    %126 = vector.broadcast %cst_55 : f32 to vector<16x1xf32>
    %127 = arith.addf %123, %126 : vector<16x1xf32>
    %128 = math.rsqrt %127 : vector<16x1xf32>
    %129 = vector.broadcast %128 : vector<16x1xf32> to vector<16x32xf32>
    %130 = arith.mulf %125, %129 : vector<16x32xf32>
    %131 = vector.broadcast %7 : vector<1x32xf32> to vector<16x32xf32>
    %132 = arith.mulf %130, %131 : vector<16x32xf32>
    %133 = vector.broadcast %8 : vector<1x32xf32> to vector<16x32xf32>
    %134 = arith.addf %132, %133 : vector<16x32xf32>
    %cst_56 = arith.constant dense<0.000000e+00> : vector<16x64xf32>
    %135 = tpu.matmul %134, %9, %cst_56 {dimension_numbers = #tpu.dot_dimension_numbers<[1], [0], [0], [1], [0, 0, 1, 1], [], []>} : vector<16x32xf32>, vector<32x64xf32>, vector<16x64xf32> -> vector<16x64xf32>
    %136 = vector.broadcast %10 : vector<1x64xf32> to vector<16x64xf32>
    %137 = arith.addf %135, %136 : vector<16x64xf32>
    %cst_57 = arith.constant 0.000000e+00 : f32
    %138 = vector.broadcast %cst_57 : f32 to vector<16x64xf32>
    %139 = arith.maximumf %137, %138 : vector<16x64xf32>
    %cst_58 = arith.constant dense<0.000000e+00> : vector<16x32xf32>
    %140 = tpu.matmul %139, %11, %cst_58 {dimension_numbers = #tpu.dot_dimension_numbers<[1], [0], [0], [1], [0, 0, 1, 1], [], []>} : vector<16x64xf32>, vector<64x32xf32>, vector<16x32xf32> -> vector<16x32xf32>
    %141 = arith.addf %112, %140 : vector<16x32xf32>
    %142 = vector.broadcast %12 : vector<1x32xf32> to vector<16x32xf32>
    %143 = arith.addf %141, %142 : vector<16x32xf32>
    %c0_59 = arith.constant 0 : index
    %c0_60 = arith.constant 0 : index
    %144 = vector.load %arg13[%c0_59, %c0_60] : memref<32x96xf32, #tpu.memory_space<vmem>>, vector<32x96xf32>
    %c0_61 = arith.constant 0 : index
    %c0_62 = arith.constant 0 : index
    %145 = vector.load %arg14[%c0_61, %c0_62] : memref<1x96xf32, #tpu.memory_space<vmem>>, vector<1x96xf32>
    %c0_63 = arith.constant 0 : index
    %c0_64 = arith.constant 0 : index
    %146 = vector.load %arg15[%c0_63, %c0_64] : memref<32x32xf32, #tpu.memory_space<vmem>>, vector<32x32xf32>
    %c0_65 = arith.constant 0 : index
    %c0_66 = arith.constant 0 : index
    %147 = vector.load %arg16[%c0_65, %c0_66] : memref<1x32xf32, #tpu.memory_space<vmem>>, vector<1x32xf32>
    %c0_67 = arith.constant 0 : index
    %c0_68 = arith.constant 0 : index
    %148 = vector.load %arg17[%c0_67, %c0_68] : memref<1x32xf32, #tpu.memory_space<vmem>>, vector<1x32xf32>
    %c0_69 = arith.constant 0 : index
    %c0_70 = arith.constant 0 : index
    %149 = vector.load %arg18[%c0_69, %c0_70] : memref<1x32xf32, #tpu.memory_space<vmem>>, vector<1x32xf32>
    %c0_71 = arith.constant 0 : index
    %c0_72 = arith.constant 0 : index
    %150 = vector.load %arg19[%c0_71, %c0_72] : memref<1x32xf32, #tpu.memory_space<vmem>>, vector<1x32xf32>
    %c0_73 = arith.constant 0 : index
    %c0_74 = arith.constant 0 : index
    %151 = vector.load %arg20[%c0_73, %c0_74] : memref<1x32xf32, #tpu.memory_space<vmem>>, vector<1x32xf32>
    %c0_75 = arith.constant 0 : index
    %c0_76 = arith.constant 0 : index
    %152 = vector.load %arg21[%c0_75, %c0_76] : memref<32x64xf32, #tpu.memory_space<vmem>>, vector<32x64xf32>
    %c0_77 = arith.constant 0 : index
    %c0_78 = arith.constant 0 : index
    %153 = vector.load %arg22[%c0_77, %c0_78] : memref<1x64xf32, #tpu.memory_space<vmem>>, vector<1x64xf32>
    %c0_79 = arith.constant 0 : index
    %c0_80 = arith.constant 0 : index
    %154 = vector.load %arg23[%c0_79, %c0_80] : memref<64x32xf32, #tpu.memory_space<vmem>>, vector<64x32xf32>
    %c0_81 = arith.constant 0 : index
    %c0_82 = arith.constant 0 : index
    %155 = vector.load %arg24[%c0_81, %c0_82] : memref<1x32xf32, #tpu.memory_space<vmem>>, vector<1x32xf32>
    %cst_83 = arith.constant dense<0.000000e+00> : vector<16xf32>
    %156 = vector.multi_reduction <add>, %143, %cst_83 [1] : vector<16x32xf32> to vector<16xf32>
    %157 = vector.shape_cast %156 : vector<16xf32> to vector<16x1xf32>
    %cst_84 = arith.constant 3.200000e+01 : f32
    %158 = vector.broadcast %cst_84 : f32 to vector<16x1xf32>
    %159 = arith.divf %157, %158 : vector<16x1xf32>
    %160 = vector.broadcast %159 : vector<16x1xf32> to vector<16x32xf32>
    %161 = arith.subf %143, %160 : vector<16x32xf32>
    %162 = arith.mulf %161, %161 : vector<16x32xf32>
    %cst_85 = arith.constant dense<0.000000e+00> : vector<16xf32>
    %163 = vector.multi_reduction <add>, %162, %cst_85 [1] : vector<16x32xf32> to vector<16xf32>
    %164 = vector.shape_cast %163 : vector<16xf32> to vector<16x1xf32>
    %cst_86 = arith.constant 3.200000e+01 : f32
    %165 = vector.broadcast %cst_86 : f32 to vector<16x1xf32>
    %166 = arith.divf %164, %165 : vector<16x1xf32>
    %167 = vector.broadcast %159 : vector<16x1xf32> to vector<16x32xf32>
    %168 = arith.subf %143, %167 : vector<16x32xf32>
    %cst_87 = arith.constant 9.99999974E-6 : f32
    %169 = vector.broadcast %cst_87 : f32 to vector<16x1xf32>
    %170 = arith.addf %166, %169 : vector<16x1xf32>
    %171 = math.rsqrt %170 : vector<16x1xf32>
    %172 = vector.broadcast %171 : vector<16x1xf32> to vector<16x32xf32>
    %173 = arith.mulf %168, %172 : vector<16x32xf32>
    %174 = vector.broadcast %148 : vector<1x32xf32> to vector<16x32xf32>
    %175 = arith.mulf %173, %174 : vector<16x32xf32>
    %176 = vector.broadcast %149 : vector<1x32xf32> to vector<16x32xf32>
    %177 = arith.addf %175, %176 : vector<16x32xf32>
    %cst_88 = arith.constant dense<0.000000e+00> : vector<16x96xf32>
    %178 = tpu.matmul %177, %144, %cst_88 {dimension_numbers = #tpu.dot_dimension_numbers<[1], [0], [0], [1], [0, 0, 1, 1], [], []>} : vector<16x32xf32>, vector<32x96xf32>, vector<16x96xf32> -> vector<16x96xf32>
    %179 = vector.broadcast %145 : vector<1x96xf32> to vector<16x96xf32>
    %180 = arith.addf %178, %179 : vector<16x96xf32>
    %181 = vector.shape_cast %180 : vector<16x96xf32> to vector<2x8x96xf32>
    %182 = vector.extract_strided_slice %181 {offsets = [0, 0, 0], sizes = [2, 8, 8], strides = [1, 1, 1]} : vector<2x8x96xf32> to vector<2x8x8xf32>
    %183 = vector.extract_strided_slice %181 {offsets = [0, 0, 32], sizes = [2, 8, 8], strides = [1, 1, 1]} : vector<2x8x96xf32> to vector<2x8x8xf32>
    %184 = vector.extract_strided_slice %181 {offsets = [0, 0, 64], sizes = [2, 8, 8], strides = [1, 1, 1]} : vector<2x8x96xf32> to vector<2x8x8xf32>
    "tpu.trace_start"() <{level = 10 : i32, message = "bqd,bkd->bqk"}> : () -> ()
    %cst_89 = arith.constant dense<0.000000e+00> : vector<2x8x8xf32>
    %185 = tpu.matmul %182, %183, %cst_89 {dimension_numbers = #tpu.dot_dimension_numbers<[2], [2], [1], [1], [0, 0, 0, 1, 1, 1], [0], [0]>} : vector<2x8x8xf32>, vector<2x8x8xf32>, vector<2x8x8xf32> -> vector<2x8x8xf32>
    "tpu.trace_stop"() : () -> ()
    %cst_90 = arith.constant 0.353553385 : f32
    %186 = vector.broadcast %cst_90 : f32 to vector<2x8x8xf32>
    %187 = arith.mulf %185, %186 : vector<2x8x8xf32>
    %cst_91 = arith.constant dense<0xFF800000> : vector<2x8xf32>
    %188 = vector.multi_reduction <maximumf>, %187, %cst_91 [2] : vector<2x8x8xf32> to vector<2x8xf32>
    %189 = vector.shape_cast %188 : vector<2x8xf32> to vector<2x8x1xf32>
    %190 = vector.broadcast %189 : vector<2x8x1xf32> to vector<2x8x8xf32>
    %191 = arith.subf %187, %190 : vector<2x8x8xf32>
    %192 = math.exp %191 : vector<2x8x8xf32>
    %cst_92 = arith.constant dense<0.000000e+00> : vector<2x8xf32>
    %193 = vector.multi_reduction <add>, %192, %cst_92 [2] : vector<2x8x8xf32> to vector<2x8xf32>
    %194 = vector.shape_cast %193 : vector<2x8xf32> to vector<2x8x1xf32>
    %195 = tpu.reciprocal %194 {approx = true} : vector<2x8x1xf32> -> vector<2x8x1xf32>
    %196 = vector.broadcast %195 : vector<2x8x1xf32> to vector<2x8x8xf32>
    %197 = arith.mulf %192, %196 : vector<2x8x8xf32>
    "tpu.trace_start"() <{level = 10 : i32, message = "bqk,bkd->bqd"}> : () -> ()
    %cst_93 = arith.constant dense<0.000000e+00> : vector<2x8x8xf32>
    %198 = tpu.matmul %197, %184, %cst_93 {dimension_numbers = #tpu.dot_dimension_numbers<[2], [1], [1], [2], [0, 0, 0, 1, 1, 2], [0], [0]>} : vector<2x8x8xf32>, vector<2x8x8xf32>, vector<2x8x8xf32> -> vector<2x8x8xf32>
    "tpu.trace_stop"() : () -> ()
    %199 = vector.extract_strided_slice %181 {offsets = [0, 0, 8], sizes = [2, 8, 8], strides = [1, 1, 1]} : vector<2x8x96xf32> to vector<2x8x8xf32>
    %200 = vector.extract_strided_slice %181 {offsets = [0, 0, 40], sizes = [2, 8, 8], strides = [1, 1, 1]} : vector<2x8x96xf32> to vector<2x8x8xf32>
    %201 = vector.extract_strided_slice %181 {offsets = [0, 0, 72], sizes = [2, 8, 8], strides = [1, 1, 1]} : vector<2x8x96xf32> to vector<2x8x8xf32>
    "tpu.trace_start"() <{level = 10 : i32, message = "bqd,bkd->bqk"}> : () -> ()
    %cst_94 = arith.constant dense<0.000000e+00> : vector<2x8x8xf32>
    %202 = tpu.matmul %199, %200, %cst_94 {dimension_numbers = #tpu.dot_dimension_numbers<[2], [2], [1], [1], [0, 0, 0, 1, 1, 1], [0], [0]>} : vector<2x8x8xf32>, vector<2x8x8xf32>, vector<2x8x8xf32> -> vector<2x8x8xf32>
    "tpu.trace_stop"() : () -> ()
    %cst_95 = arith.constant 0.353553385 : f32
    %203 = vector.broadcast %cst_95 : f32 to vector<2x8x8xf32>
    %204 = arith.mulf %202, %203 : vector<2x8x8xf32>
    %cst_96 = arith.constant dense<0xFF800000> : vector<2x8xf32>
    %205 = vector.multi_reduction <maximumf>, %204, %cst_96 [2] : vector<2x8x8xf32> to vector<2x8xf32>
    %206 = vector.shape_cast %205 : vector<2x8xf32> to vector<2x8x1xf32>
    %207 = vector.broadcast %206 : vector<2x8x1xf32> to vector<2x8x8xf32>
    %208 = arith.subf %204, %207 : vector<2x8x8xf32>
    %209 = math.exp %208 : vector<2x8x8xf32>
    %cst_97 = arith.constant dense<0.000000e+00> : vector<2x8xf32>
    %210 = vector.multi_reduction <add>, %209, %cst_97 [2] : vector<2x8x8xf32> to vector<2x8xf32>
    %211 = vector.shape_cast %210 : vector<2x8xf32> to vector<2x8x1xf32>
    %212 = tpu.reciprocal %211 {approx = true} : vector<2x8x1xf32> -> vector<2x8x1xf32>
    %213 = vector.broadcast %212 : vector<2x8x1xf32> to vector<2x8x8xf32>
    %214 = arith.mulf %209, %213 : vector<2x8x8xf32>
    "tpu.trace_start"() <{level = 10 : i32, message = "bqk,bkd->bqd"}> : () -> ()
    %cst_98 = arith.constant dense<0.000000e+00> : vector<2x8x8xf32>
    %215 = tpu.matmul %214, %201, %cst_98 {dimension_numbers = #tpu.dot_dimension_numbers<[2], [1], [1], [2], [0, 0, 0, 1, 1, 2], [0], [0]>} : vector<2x8x8xf32>, vector<2x8x8xf32>, vector<2x8x8xf32> -> vector<2x8x8xf32>
    "tpu.trace_stop"() : () -> ()
    %216 = vector.extract_strided_slice %181 {offsets = [0, 0, 16], sizes = [2, 8, 8], strides = [1, 1, 1]} : vector<2x8x96xf32> to vector<2x8x8xf32>
    %217 = vector.extract_strided_slice %181 {offsets = [0, 0, 48], sizes = [2, 8, 8], strides = [1, 1, 1]} : vector<2x8x96xf32> to vector<2x8x8xf32>
    %218 = vector.extract_strided_slice %181 {offsets = [0, 0, 80], sizes = [2, 8, 8], strides = [1, 1, 1]} : vector<2x8x96xf32> to vector<2x8x8xf32>
    "tpu.trace_start"() <{level = 10 : i32, message = "bqd,bkd->bqk"}> : () -> ()
    %cst_99 = arith.constant dense<0.000000e+00> : vector<2x8x8xf32>
    %219 = tpu.matmul %216, %217, %cst_99 {dimension_numbers = #tpu.dot_dimension_numbers<[2], [2], [1], [1], [0, 0, 0, 1, 1, 1], [0], [0]>} : vector<2x8x8xf32>, vector<2x8x8xf32>, vector<2x8x8xf32> -> vector<2x8x8xf32>
    "tpu.trace_stop"() : () -> ()
    %cst_100 = arith.constant 0.353553385 : f32
    %220 = vector.broadcast %cst_100 : f32 to vector<2x8x8xf32>
    %221 = arith.mulf %219, %220 : vector<2x8x8xf32>
    %cst_101 = arith.constant dense<0xFF800000> : vector<2x8xf32>
    %222 = vector.multi_reduction <maximumf>, %221, %cst_101 [2] : vector<2x8x8xf32> to vector<2x8xf32>
    %223 = vector.shape_cast %222 : vector<2x8xf32> to vector<2x8x1xf32>
    %224 = vector.broadcast %223 : vector<2x8x1xf32> to vector<2x8x8xf32>
    %225 = arith.subf %221, %224 : vector<2x8x8xf32>
    %226 = math.exp %225 : vector<2x8x8xf32>
    %cst_102 = arith.constant dense<0.000000e+00> : vector<2x8xf32>
    %227 = vector.multi_reduction <add>, %226, %cst_102 [2] : vector<2x8x8xf32> to vector<2x8xf32>
    %228 = vector.shape_cast %227 : vector<2x8xf32> to vector<2x8x1xf32>
    %229 = tpu.reciprocal %228 {approx = true} : vector<2x8x1xf32> -> vector<2x8x1xf32>
    %230 = vector.broadcast %229 : vector<2x8x1xf32> to vector<2x8x8xf32>
    %231 = arith.mulf %226, %230 : vector<2x8x8xf32>
    "tpu.trace_start"() <{level = 10 : i32, message = "bqk,bkd->bqd"}> : () -> ()
    %cst_103 = arith.constant dense<0.000000e+00> : vector<2x8x8xf32>
    %232 = tpu.matmul %231, %218, %cst_103 {dimension_numbers = #tpu.dot_dimension_numbers<[2], [1], [1], [2], [0, 0, 0, 1, 1, 2], [0], [0]>} : vector<2x8x8xf32>, vector<2x8x8xf32>, vector<2x8x8xf32> -> vector<2x8x8xf32>
    "tpu.trace_stop"() : () -> ()
    %233 = vector.extract_strided_slice %181 {offsets = [0, 0, 24], sizes = [2, 8, 8], strides = [1, 1, 1]} : vector<2x8x96xf32> to vector<2x8x8xf32>
    %234 = vector.extract_strided_slice %181 {offsets = [0, 0, 56], sizes = [2, 8, 8], strides = [1, 1, 1]} : vector<2x8x96xf32> to vector<2x8x8xf32>
    %235 = vector.extract_strided_slice %181 {offsets = [0, 0, 88], sizes = [2, 8, 8], strides = [1, 1, 1]} : vector<2x8x96xf32> to vector<2x8x8xf32>
    "tpu.trace_start"() <{level = 10 : i32, message = "bqd,bkd->bqk"}> : () -> ()
    %cst_104 = arith.constant dense<0.000000e+00> : vector<2x8x8xf32>
    %236 = tpu.matmul %233, %234, %cst_104 {dimension_numbers = #tpu.dot_dimension_numbers<[2], [2], [1], [1], [0, 0, 0, 1, 1, 1], [0], [0]>} : vector<2x8x8xf32>, vector<2x8x8xf32>, vector<2x8x8xf32> -> vector<2x8x8xf32>
    "tpu.trace_stop"() : () -> ()
    %cst_105 = arith.constant 0.353553385 : f32
    %237 = vector.broadcast %cst_105 : f32 to vector<2x8x8xf32>
    %238 = arith.mulf %236, %237 : vector<2x8x8xf32>
    %cst_106 = arith.constant dense<0xFF800000> : vector<2x8xf32>
    %239 = vector.multi_reduction <maximumf>, %238, %cst_106 [2] : vector<2x8x8xf32> to vector<2x8xf32>
    %240 = vector.shape_cast %239 : vector<2x8xf32> to vector<2x8x1xf32>
    %241 = vector.broadcast %240 : vector<2x8x1xf32> to vector<2x8x8xf32>
    %242 = arith.subf %238, %241 : vector<2x8x8xf32>
    %243 = math.exp %242 : vector<2x8x8xf32>
    %cst_107 = arith.constant dense<0.000000e+00> : vector<2x8xf32>
    %244 = vector.multi_reduction <add>, %243, %cst_107 [2] : vector<2x8x8xf32> to vector<2x8xf32>
    %245 = vector.shape_cast %244 : vector<2x8xf32> to vector<2x8x1xf32>
    %246 = tpu.reciprocal %245 {approx = true} : vector<2x8x1xf32> -> vector<2x8x1xf32>
    %247 = vector.broadcast %246 : vector<2x8x1xf32> to vector<2x8x8xf32>
    %248 = arith.mulf %243, %247 : vector<2x8x8xf32>
    "tpu.trace_start"() <{level = 10 : i32, message = "bqk,bkd->bqd"}> : () -> ()
    %cst_108 = arith.constant dense<0.000000e+00> : vector<2x8x8xf32>
    %249 = tpu.matmul %248, %235, %cst_108 {dimension_numbers = #tpu.dot_dimension_numbers<[2], [1], [1], [2], [0, 0, 0, 1, 1, 2], [0], [0]>} : vector<2x8x8xf32>, vector<2x8x8xf32>, vector<2x8x8xf32> -> vector<2x8x8xf32>
    "tpu.trace_stop"() : () -> ()
    %250 = tpu.concatenate %197, %214, %231, %248 in 2 : vector<2x8x8xf32>, vector<2x8x8xf32>, vector<2x8x8xf32>, vector<2x8x8xf32> -> vector<2x8x32xf32>
    %c0_109 = arith.constant 0 : index
    %c0_110 = arith.constant 0 : index
    %c0_111 = arith.constant 0 : index
    %251 = vector.load %arg28[%c0_109, %c0_110, %c0_111] : memref<2x8x32xf32, #tpu.memory_space<vmem>>, vector<2x8x32xf32>
    tpu.vector_store %arg28[%c0_109, %c0_110, %c0_111], %250 {strides = array<i32>} : memref<2x8x32xf32, #tpu.memory_space<vmem>>, vector<2x8x32xf32>,
    %252 = tpu.concatenate %198, %215, %232, %249 in 2 : vector<2x8x8xf32>, vector<2x8x8xf32>, vector<2x8x8xf32>, vector<2x8x8xf32> -> vector<2x8x32xf32>
    %253 = vector.shape_cast %252 : vector<2x8x32xf32> to vector<16x32xf32>
    %cst_112 = arith.constant dense<0.000000e+00> : vector<16x32xf32>
    %254 = tpu.matmul %253, %146, %cst_112 {dimension_numbers = #tpu.dot_dimension_numbers<[1], [0], [0], [1], [0, 0, 1, 1], [], []>} : vector<16x32xf32>, vector<32x32xf32>, vector<16x32xf32> -> vector<16x32xf32>
    %255 = arith.addf %143, %254 : vector<16x32xf32>
    %256 = vector.broadcast %147 : vector<1x32xf32> to vector<16x32xf32>
    %257 = arith.addf %255, %256 : vector<16x32xf32>
    %cst_113 = arith.constant dense<0.000000e+00> : vector<16xf32>
    %258 = vector.multi_reduction <add>, %257, %cst_113 [1] : vector<16x32xf32> to vector<16xf32>
    %259 = vector.shape_cast %258 : vector<16xf32> to vector<16x1xf32>
    %cst_114 = arith.constant 3.200000e+01 : f32
    %260 = vector.broadcast %cst_114 : f32 to vector<16x1xf32>
    %261 = arith.divf %259, %260 : vector<16x1xf32>
    %262 = vector.broadcast %261 : vector<16x1xf32> to vector<16x32xf32>
    %263 = arith.subf %257, %262 : vector<16x32xf32>
    %264 = arith.mulf %263, %263 : vector<16x32xf32>
    %cst_115 = arith.constant dense<0.000000e+00> : vector<16xf32>
    %265 = vector.multi_reduction <add>, %264, %cst_115 [1] : vector<16x32xf32> to vector<16xf32>
    %266 = vector.shape_cast %265 : vector<16xf32> to vector<16x1xf32>
    %cst_116 = arith.constant 3.200000e+01 : f32
    %267 = vector.broadcast %cst_116 : f32 to vector<16x1xf32>
    %268 = arith.divf %266, %267 : vector<16x1xf32>
    %269 = vector.broadcast %261 : vector<16x1xf32> to vector<16x32xf32>
    %270 = arith.subf %257, %269 : vector<16x32xf32>
    %cst_117 = arith.constant 9.99999974E-6 : f32
    %271 = vector.broadcast %cst_117 : f32 to vector<16x1xf32>
    %272 = arith.addf %268, %271 : vector<16x1xf32>
    %273 = math.rsqrt %272 : vector<16x1xf32>
    %274 = vector.broadcast %273 : vector<16x1xf32> to vector<16x32xf32>
    %275 = arith.mulf %270, %274 : vector<16x32xf32>
    %276 = vector.broadcast %150 : vector<1x32xf32> to vector<16x32xf32>
    %277 = arith.mulf %275, %276 : vector<16x32xf32>
    %278 = vector.broadcast %151 : vector<1x32xf32> to vector<16x32xf32>
    %279 = arith.addf %277, %278 : vector<16x32xf32>
    %cst_118 = arith.constant dense<0.000000e+00> : vector<16x64xf32>
    %280 = tpu.matmul %279, %152, %cst_118 {dimension_numbers = #tpu.dot_dimension_numbers<[1], [0], [0], [1], [0, 0, 1, 1], [], []>} : vector<16x32xf32>, vector<32x64xf32>, vector<16x64xf32> -> vector<16x64xf32>
    %281 = vector.broadcast %153 : vector<1x64xf32> to vector<16x64xf32>
    %282 = arith.addf %280, %281 : vector<16x64xf32>
    %cst_119 = arith.constant 0.000000e+00 : f32
    %283 = vector.broadcast %cst_119 : f32 to vector<16x64xf32>
    %284 = arith.maximumf %282, %283 : vector<16x64xf32>
    %cst_120 = arith.constant dense<0.000000e+00> : vector<16x32xf32>
    %285 = tpu.matmul %284, %154, %cst_120 {dimension_numbers = #tpu.dot_dimension_numbers<[1], [0], [0], [1], [0, 0, 1, 1], [], []>} : vector<16x64xf32>, vector<64x32xf32>, vector<16x32xf32> -> vector<16x32xf32>
    %286 = arith.addf %257, %285 : vector<16x32xf32>
    %287 = vector.broadcast %155 : vector<1x32xf32> to vector<16x32xf32>
    %288 = arith.addf %286, %287 : vector<16x32xf32>
    %c0_121 = arith.constant 0 : index
    %c0_122 = arith.constant 0 : index
    %289 = vector.load %arg25[%c0_121, %c0_122] : memref<1x32xf32, #tpu.memory_space<vmem>>, vector<1x32xf32>
    %c0_123 = arith.constant 0 : index
    %c0_124 = arith.constant 0 : index
    %290 = vector.load %arg26[%c0_123, %c0_124] : memref<1x32xf32, #tpu.memory_space<vmem>>, vector<1x32xf32>
    %cst_125 = arith.constant dense<0.000000e+00> : vector<16xf32>
    %291 = vector.multi_reduction <add>, %288, %cst_125 [1] : vector<16x32xf32> to vector<16xf32>
    %292 = vector.shape_cast %291 : vector<16xf32> to vector<16x1xf32>
    %cst_126 = arith.constant 3.200000e+01 : f32
    %293 = vector.broadcast %cst_126 : f32 to vector<16x1xf32>
    %294 = arith.divf %292, %293 : vector<16x1xf32>
    %295 = vector.broadcast %294 : vector<16x1xf32> to vector<16x32xf32>
    %296 = arith.subf %288, %295 : vector<16x32xf32>
    %297 = arith.mulf %296, %296 : vector<16x32xf32>
    %cst_127 = arith.constant dense<0.000000e+00> : vector<16xf32>
    %298 = vector.multi_reduction <add>, %297, %cst_127 [1] : vector<16x32xf32> to vector<16xf32>
    %299 = vector.shape_cast %298 : vector<16xf32> to vector<16x1xf32>
    %cst_128 = arith.constant 3.200000e+01 : f32
    %300 = vector.broadcast %cst_128 : f32 to vector<16x1xf32>
    %301 = arith.divf %299, %300 : vector<16x1xf32>
    %302 = vector.broadcast %294 : vector<16x1xf32> to vector<16x32xf32>
    %303 = arith.subf %288, %302 : vector<16x32xf32>
    %cst_129 = arith.constant 9.99999974E-6 : f32
    %304 = vector.broadcast %cst_129 : f32 to vector<16x1xf32>
    %305 = arith.addf %301, %304 : vector<16x1xf32>
    %306 = math.rsqrt %305 : vector<16x1xf32>
    %307 = vector.broadcast %306 : vector<16x1xf32> to vector<16x32xf32>
    %308 = arith.mulf %303, %307 : vector<16x32xf32>
    %309 = vector.broadcast %289 : vector<1x32xf32> to vector<16x32xf32>
    %310 = arith.mulf %308, %309 : vector<16x32xf32>
    %311 = vector.broadcast %290 : vector<1x32xf32> to vector<16x32xf32>
    %312 = arith.addf %310, %311 : vector<16x32xf32>
    %c0_130 = arith.constant 0 : index
    %c0_131 = arith.constant 0 : index
    %313 = vector.load %arg27[%c0_130, %c0_131] : memref<16x32xf32, #tpu.memory_space<vmem>>, vector<16x32xf32>
    tpu.vector_store %arg27[%c0_130, %c0_131], %312 {strides = array<i32>} : memref<16x32xf32, #tpu.memory_space<vmem>>, vector<16x32xf32>,
    return
  }
}

</mosaic_0001>

<bundles_post_ra>
// kernel: encoder_forward.1
= control target key start
LH: loop header
LB: loop body
LE: loop exit
PB: predicated region body
PF: predicated region fallthrough
CT: control target
= control target key end

     0   :  { %s2834_s0 = inlined_call_operand.vmem [shape: f32[16,32], index: 0, kind: input, shape index: {}]   ;;  %s2835_s1 = inlined_call_operand.vmem [shape: f32[32,96], index: 1, kind: input, shape index: {}]   ;;  %s2836_s2 = inlined_call_operand.vmem [shape: f32[1,96], index: 2, kind: input, shape index: {}]   ;;  %s2837_s3 = inlined_call_operand.vmem [shape: f32[32,32], index: 3, kind: input, shape index: {}]   ;;  %s2838_s4 = inlined_call_operand.vmem [shape: f32[1,32], index: 4, kind: input, shape index: {}]   ;;  %s2839_s5 = inlined_call_operand.vmem [shape: f32[1,32], index: 5, kind: input, shape index: {}]   ;;  %s2840_s6 = inlined_call_operand.vmem [shape: f32[1,32], index: 6, kind: input, shape index: {}]   ;;  %s2841_s7 = inlined_call_operand.vmem [shape: f32[1,32], index: 7, kind: input, shape index: {}]   ;;  %s2842_s8 = inlined_call_operand.vmem [shape: f32[1,32], index: 8, kind: input, shape index: {}]   ;;  %s2843_s9 = inlined_call_operand.vmem [shape: f32[32,64], index: 9, kind: input, shape index: {}]   ;;  %s2844_s10 = inlined_call_operand.vmem [shape: f32[1,64], index: 10, kind: input, shape index: {}]   ;;  %s2845_s11 = inlined_call_operand.vmem [shape: f32[64,32], index: 11, kind: input, shape index: {}]   ;;  %s2846_s12 = inlined_call_operand.vmem [shape: f32[1,32], index: 12, kind: input, shape index: {}]   ;;  %s2847_s13 = inlined_call_operand.vmem [shape: f32[32,96], index: 13, kind: input, shape index: {}]   ;;  %s2848_s14 = inlined_call_operand.vmem [shape: f32[1,96], index: 14, kind: input, shape index: {}]   ;;  %s2849_s15 = inlined_call_operand.vmem [shape: f32[32,32], index: 15, kind: input, shape index: {}]   ;;  %s2850_s16 = inlined_call_operand.vmem [shape: f32[1,32], index: 16, kind: input, shape index: {}]   ;;  %s2851_s17 = inlined_call_operand.vmem [shape: f32[1,32], index: 17, kind: input, shape index: {}]   ;;  %s2852_s18 = inlined_call_operand.vmem [shape: f32[1,32], index: 18, kind: input, shape index: {}]   ;;  %s2853_s19 = inlined_call_operand.vmem [shape: f32[1,32], index: 19, kind: input, shape index: {}]   ;;  %s2854_s20 = inlined_call_operand.vmem [shape: f32[1,32], index: 20, kind: input, shape index: {}]   ;;  %s2855_s21 = inlined_call_operand.vmem [shape: f32[32,64], index: 21, kind: input, shape index: {}]   ;;  %s2856_s22 = inlined_call_operand.vmem [shape: f32[1,64], index: 22, kind: input, shape index: {}]   ;;  %s2857_s23 = inlined_call_operand.vmem [shape: f32[64,32], index: 23, kind: input, shape index: {}]   ;;  %s2858_s24 = inlined_call_operand.vmem [shape: f32[1,32], index: 24, kind: input, shape index: {}]   ;;  %s2859_s25 = inlined_call_operand.vmem [shape: f32[1,32], index: 25, kind: input, shape index: {}]   ;;  %s2860_s26 = inlined_call_operand.vmem [shape: f32[1,32], index: 26, kind: input, shape index: {}]   ;;  %s2861_s27 = inlined_call_operand.hbm [shape: f32[16,32], index: 27, kind: output, shape index: {0}]   ;;  %s2862_s28 = inlined_call_operand.vmem [shape: f32[2,8,32], index: 28, kind: output, shape index: {1}]  }
   0x1   :  { %2882 = sst [smem:[#allocation5_spill]] %s2834_s0 }
   0x2   :  { %2883 = sst [smem:[#allocation6_spill]] %s2835_s1 }
   0x3   :  { %2884 = sst [smem:[#allocation7_spill]] %s2836_s2 }
   0x4   :  { %2885 = sst [smem:[#allocation8_spill]] %s2837_s3 }
   0x5   :  { %2886 = sst [smem:[#allocation9_spill]] %s2838_s4 }
   0x6   :  { %2887 = sst [smem:[#allocation10_spill]] %s2839_s5 }
   0x7   :  { %2888 = sst [smem:[#allocation11_spill]] %s2840_s6 }
   0x8   :  { %2889 = sst [smem:[#allocation12_spill]] %s2841_s7 }
   0x9   :  { %2890 = sst [smem:[#allocation13_spill]] %s2842_s8 }
   0xa   :  { %2891 = sst [smem:[#allocation14_spill]] %s2843_s9 }
   0xb   :  { %2892 = sst [smem:[#allocation15_spill]] %s2844_s10 }
   0xc   :  { %2893 = sst [smem:[#allocation16_spill]] %s2845_s11 }
   0xd   :  { %2894 = sst [smem:[#allocation17_spill]] %s2846_s12 }
   0xe   :  { %s2895_s9 = sld [smem:[#allocation5_spill]]  ;;  %vm119_vm0 = vcmask 261120  }
  0x14   :  { %v2275_v0 = vld [vmem:[%s2895_s9] sm:$0xff]  ;;  %v2282_v2 = vld [vmem:[%s2895_s9 + $0x8] sm:$0xff] }
  0x15   :  { %v120_v1 = vsel %vm119_vm0, %v2275_v0, 0.0 }
  0x16   :  { %121 = vadd.xlane.f32.xlu0 %v120_v1 }
  0x17   :  { %34 = vsyncpa [#allocation3], 0  ;;  %v123_v3 = vsel %vm119_vm0, %v2282_v2, 0.0  ;;  %v2110_v4 = vmov 32.0   ;;  %s2896_s0 = sld [smem:[#allocation6_spill]]  ;;  %s2111_s11 = smov 96  }
  0x18   :  { %1998 = vrcp.f32 %v2110_v4  ;;  %s2897_s5 = sld [smem:[#allocation10_spill]]  ;;  %s2112_s29 = smov 120   ;;  %vm216_vm8 = vcmask 64512   ;;  %vm766_vm9 = vcmask 130048   ;;  %vm769_vm10 = vcmask 195584  }
  0x19   :  { %s2898_s3 = sld [smem:[#allocation11_spill]]  ;;  %s2113_s2 = smov 88  }
  0x1a   :  { %s2872_s7 = smov 104   ;;  %s2115_s12 = smov 112  }
  0x1b   :  { %s2878_s1 = smov 72   ;;  %s2874_s4 = smov 80  }
  0x1c   :  { %s2868_s8 = smov 56   ;;  %s2870_s9 = smov 48  }
  0x1d   :  { %v94_v21 = vld [vmem:[%s2896_s0 + $0x18] sm:$0xff]  ;;  %v93_v22 = vld [vmem:[%s2896_s0 + $0x10] sm:$0xff]  ;;  %v92_v23 = vld [vmem:[%s2896_s0 + $0x8] sm:$0xff]  ;;  %s2869_s30 = smov 40   ;;  %s2123_s6 = smov 16  }
  0x1e   :  { %124 = vadd.xlane.f32.xlu0 %v123_v3  ;;  %v1999_v5 = vpop.eup %1998  ;;  %202 = vmatpush.msra.mxu0 %v94_v21  ;;  %v91_v24 = vld [vmem:[%s2896_s0] sm:$0xff]  ;;  %s2899_s0 = sld [smem:[#allocation7_spill]]  ;;  %s2880_s10 = smov 24  }
  0x1f   :  { %v127_v6 = vmul.f32 32.0, %v1999_v5  ;;  %vm131_vm1 = vweird.f32 %v1999_v5  ;;  %v1980_v39 = vld [vmem:[%s2897_s5] ss:$0 sm:$0xff]  ;;  %s2871_s5 = smov 64  }
  0x20   :  { %203 = vmatpush.msra.mxu0 %v93_v22  ;;  %v1981_v43 = vld [vmem:[%s2898_s3] ss:$0 sm:$0xff]  ;;  %s2876_s3 = smov 8  }
  0x21   :  { %v128_v7 = vsub.f32 1.0, %v127_v6 }
  0x22   :  { %204 = vmatpush.msra.mxu0 %v92_v23 }
  0x23   :  { %v129_v8 = vmul.f32 %v1999_v5, %v128_v7 }
  0x24   :  { %205 = vmatpush.msra.mxu0 %v91_v24  ;;  %v1982_v53 = vld [vmem:[%s2899_s0] ss:$0 sm:$0xff]  ;;  %s2914_s0 = smov 56  }
  0x25   :  { %v130_v9 = vadd.f32 %v1999_v5, %v129_v8 }
  0x27   :  { %v2286_v10 = vsel %vm131_vm1, %v1999_v5, %v130_v9 }
  0x89   :  { %v122_v11 = vpop.xlane.xlu0 %121 }
  0x8a   :  { %v133_v12 = vmul.f32 %v2286_v10, %v122_v11 }
  0x8c   :  { %v135_v13 = vsub.f32 %v2275_v0, %v133_v12 }
  0x8e   :  { %v137_v14 = vmul.f32 %v135_v13, %v135_v13 }
  0x90   :  { %v139_v15 = vsel %vm119_vm0, %v137_v14, 0.0 }
  0x91   :  { %140 = vadd.xlane.f32.xlu1 %v139_v15  ;;  %v125_v16 = vpop.xlane.xlu0 %124 }
  0x92   :  { %v134_v17 = vmul.f32 %v2286_v10, %v125_v16 }
  0x94   :  { %v136_v18 = vsub.f32 %v2282_v2, %v134_v17 }
  0x96   :  { %v138_v19 = vmul.f32 %v136_v18, %v136_v18 }
  0x98   :  { %v142_v20 = vsel %vm119_vm0, %v138_v19, 0.0 }
  0x99   :  { %143 = vadd.xlane.f32.xlu1 %v142_v20 }
 0x104   :  { %v141_v25 = vpop.xlane.xlu1 %140 }
 0x105   :  { %v145_v26 = vmul.f32 %v141_v25, %v2286_v10 }
 0x107   :  { %v147_v27 = vadd.f32 1e-05, %v145_v26 }
 0x109   :  { %2000 = vrsqrt.f32 %v147_v27  ;;  %vm155_vm3 = vweird.f32 %v147_v27 }
 0x10c   :  { %v144_v28 = vpop.xlane.xlu1 %143 }
 0x10d   :  { %v146_v29 = vmul.f32 %v144_v28, %v2286_v10 }
 0x10f   :  { %v2001_v30 = vpop.eup %2000  ;;  %v148_v31 = vadd.f32 1e-05, %v146_v29 }
 0x110   :  { %v150_v32 = vmul.f32 %v2001_v30, %v147_v27  ;;  %vm156_vm2 = vweird.f32 %v2001_v30 }
 0x111   :  { %2002 = vrsqrt.f32 %v148_v31  ;;  %vm157_vm4 = vmor %vm155_vm3, %vm156_vm2  ;;  %vm165_vm6 = vweird.f32 %v148_v31  ;;  %vm896_vm2 = vcmask 523264  }
 0x112   :  { %v151_v33 = vmul.f32 %v2001_v30, %v150_v32 }
 0x114   :  { %v152_v34 = vmul.f32 0.5, %v151_v33 }
 0x116   :  { %v153_v35 = vsub.f32 1.5, %v152_v34 }
 0x117   :  { %v2003_v36 = vpop.eup %2002 }
 0x118   :  { %v154_v37 = vmul.f32 %v2001_v30, %v153_v35  ;;  %v160_v38 = vmul.f32 %v2003_v36, %v148_v31  ;;  %vm166_vm5 = vweird.f32 %v2003_v36 }
 0x119   :  { %vm167_vm7 = vmor %vm165_vm6, %vm166_vm5 }
 0x11a   :  { %v158_v40 = vsel %vm157_vm4, %v2001_v30, %v154_v37  ;;  %v161_v41 = vmul.f32 %v2003_v36, %v160_v38 }
 0x11b   :  { %v169_v42 = vmul.f32 %v158_v40, %v135_v13 }
 0x11c   :  { %v162_v44 = vmul.f32 0.5, %v161_v41 }
 0x11d   :  { %v174_v45 = vmul.f32 %v1980_v39, %v169_v42 }
 0x11e   :  { %v163_v46 = vsub.f32 1.5, %v162_v44 }
 0x11f   :  { %v179_v47 = vadd.f32 %v1981_v43, %v174_v45 }
 0x120   :  { %v164_v48 = vmul.f32 %v2003_v36, %v163_v46 }
 0x121   :  { %1869 = vmatmul.msk.f32.vlgmr.msra.gmra.mxu0 %vm119_vm0, %v179_v47 }
 0x122   :  { %v168_v49 = vsel %vm167_vm7, %v2003_v36, %v164_v48 }
 0x123   :  { %v170_v50 = vmul.f32 %v168_v49, %v136_v18 }
 0x125   :  { %v175_v51 = vmul.f32 %v1980_v39, %v170_v50 }
 0x127   :  { %v180_v52 = vadd.f32 %v1981_v43, %v175_v51 }
 0x129   :  { %1870 = vmatmul.msk.f32.gmra.mxu0 %vm119_vm0, %v180_v52 }
 0x19e   :  { %v207_v54 = vpop.f32.mrf.mxu0 }
 0x19f   :  { %v2319_v55 = vadd.f32 %v1982_v53, %v207_v54 }
 0x1a1   :  { %214 = vrot.lane.b32.xlu2 %v2319_v55, %s2111_s11 }
 0x1a6   :  { %v210_v56 = vpop.f32.mrf.mxu0 }
 0x1a7   :  { %v2323_v57 = vadd.f32 %v1982_v53, %v210_v56 }
 0x1a9   :  { %372 = vrot.lane.b32.xlu1 %v2323_v57, %s2112_s29  ;;  %374 = vrot.lane.b32.xlu0 %v2323_v57, %s2113_s2  ;;  %v1955_v35 = vpack.i.bf16 %v2323_v57, %v2319_v55 }
 0x1aa   :  { %242 = vrot.lane.b32.xlu2 %v2323_v57, %s2111_s11 }
 0x1b1   :  { %608 = vrot.lane.b32.xlu1 %v2319_v55, %s2872_s7  ;;  %476 = vrot.lane.b32.xlu0 %v2319_v55, %s2115_s12 }
 0x1b2   :  { %346 = vrot.lane.b32.xlu2 %v2319_v55, %s2113_s2 }
 0x1b9   :  { %638 = vrot.lane.b32.xlu1 %v2323_v57, %s2878_s1  ;;  %506 = vrot.lane.b32.xlu0 %v2323_v57, %s2874_s4 }
 0x1ba   :  { %478 = vrot.lane.b32.xlu2 %v2319_v55, %s2874_s4  ;;  %s2901_s4 = sld [smem:[#allocation9_spill]] }
 0x1c1   :  { %636 = vrot.lane.b32.xlu0 %v2323_v57, %s2872_s7  ;;  %s2904_s7 = sld [smem:[#allocation12_spill]] }
 0x1c2   :  { %344 = vrot.lane.b32.xlu2 %v2319_v55, %s2112_s29 }
 0x1ca   :  { %610 = vrot.lane.b32.xlu2 %v2319_v55, %s2878_s1 }
 0x1d2   :  { %504 = vrot.lane.b32.xlu2 %v2323_v57, %s2115_s12 }
 0x1fb   :  { %v215_v58 = vpop.permute.xlu2 %214 }
 0x1fc   :  { %1871 = vmatpush.xpose.msk.msra.mxu2 %vm216_vm8, %v215_v58 }
 0x1ff   :  { %1872 = vmatmul.msk.f32.vlgmr.msra.gmra.mxu2 %vm216_vm8, %v2319_v55 }
 0x204   :  { %v243_v59 = vpop.permute.xlu2 %242 }
 0x205   :  { %1873 = vmatpush.xpose.msk.msrb.mxu2 %vm216_vm8, %v243_v59 }
 0x208   :  { %1874 = vmatmul.msk.f32.vlgmr.msrb.gmra.mxu2 %vm216_vm8, %v2323_v57 }
 0x20c   :  { %v347_v60 = vpop.permute.xlu2 %346 }
 0x20d   :  { %1877 = vmatpush.xpose.msk.msra.mxu1 %vm216_vm8, %v347_v60 }
 0x214   :  { %v479_v61 = vpop.permute.xlu2 %478 }
 0x21b   :  { %v373_v62 = vpop.permute.xlu1 %372  ;;  %v375_v63 = vpop.permute.xlu0 %374 }
 0x21c   :  { %v345_v1 = vpop.permute.xlu2 %344  ;;  %1879 = vmatpush.xpose.msk.msra.mxu2 %vm216_vm8, %v375_v63 }
 0x21d   :  { %1878 = vmatmul.msk.f32.vlgmr.msra.gmra.mxu1 %vm216_vm8, %v345_v1 }
 0x21f   :  { %1880 = vmatmul.msk.f32.vlgmr.msra.gmra.mxu2 %vm216_vm8, %v373_v62 }
 0x220   :  { %1883 = vmatpush.xpose.msk.msrb.mxu2 %vm216_vm8, %v479_v61 }
 0x223   :  { %v609_v3 = vpop.permute.xlu1 %608  ;;  %v477_v4 = vpop.permute.xlu0 %476 }
 0x224   :  { %v611_v5 = vpop.permute.xlu2 %610 }
 0x225   :  { %1889 = vmatpush.xpose.msk.msra.mxu2 %vm216_vm8, %v611_v5 }
 0x227   :  { %1884 = vmatmul.msk.f32.vlgmr.msrb.gmra.mxu2 %vm216_vm8, %v477_v4 }
 0x22b   :  { %v639_v6 = vpop.permute.xlu1 %638  ;;  %v507_v7 = vpop.permute.xlu0 %506 }
 0x22c   :  { %1885 = vmatpush.xpose.msk.msrb.mxu0 %vm216_vm8, %v507_v7  ;;  %v505_v8 = vpop.permute.xlu2 %504 }
 0x22f   :  { %1886 = vmatmul.msk.f32.vlgmr.msrb.gmra.mxu0 %vm216_vm8, %v505_v8  ;;  %1890 = vmatmul.msk.f32.vlgmr.msra.gmra.mxu2 %vm216_vm8, %v609_v3 }
 0x230   :  { %1891 = vmatpush.xpose.msk.msra.mxu0 %vm216_vm8, %v639_v6 }
 0x233   :  { %v637_v9 = vpop.permute.xlu0 %636 }
 0x237   :  { %1892 = vmatmul.msk.f32.vlgmr.msra.gmra.mxu0 %vm216_vm8, %v637_v9 }
 0x282   :  { %v238_v11 = vpop.f32.mrf.mxu2 }
 0x283   :  { %v268_v12 = vmul.f32 0.35355338, %v238_v11 }
 0x285   :  { %v270_v13 = vsel %vm216_vm8, %v268_v12, -inf }
 0x286   :  { %271 = vmax.xlane.f32.xlu2 %v270_v13 }
 0x28b   :  { %v265_v14 = vpop.f32.mrf.mxu2 }
 0x28c   :  { %v269_v15 = vmul.f32 0.35355338, %v265_v14 }
 0x28e   :  { %v273_v16 = vsel %vm216_vm8, %v269_v15, -inf }
 0x28f   :  { %274 = vmax.xlane.f32.xlu1 %v273_v16 }
 0x29a   :  { %v369_v17 = vpop.f32.mrf.mxu1 }
 0x29b   :  { %v400_v18 = vmul.f32 0.35355338, %v369_v17 }
 0x29d   :  { %v402_v19 = vsel %vm216_vm8, %v400_v18, -inf }
 0x29e   :  { %403 = vmax.xlane.f32.xlu0 %v402_v19 }
 0x2a2   :  { %v397_v20 = vpop.f32.mrf.mxu2 }
 0x2a3   :  { %v401_v33 = vmul.f32 0.35355338, %v397_v20 }
 0x2a5   :  { %v405_v34 = vsel %vm216_vm8, %v401_v33, -inf }
 0x2aa   :  { %v501_v21 = vpop.f32.mrf.mxu2 }
 0x2ab   :  { %v532_v26 = vmul.f32 0.35355338, %v501_v21 }
 0x2ac   :  { %v529_v22 = vpop.f32.mrf.mxu0 }
 0x2ad   :  { %v533_v23 = vmul.f32 0.35355338, %v529_v22  ;;  %v534_v32 = vsel %vm216_vm8, %v532_v26, -inf }
 0x2af   :  { %v537_v24 = vsel %vm216_vm8, %v533_v23, -inf }
 0x2b0   :  { %538 = vmax.xlane.f32.xlu2 %v537_v24 }
 0x2b2   :  { %v633_v25 = vpop.f32.mrf.mxu2 }
 0x2b3   :  { %v2373_v27 = vmul.f32 0.35355338, %v633_v25 }
 0x2b4   :  { %v661_v28 = vpop.f32.mrf.mxu0 }
 0x2b5   :  { %v665_v29 = vmul.f32 0.35355338, %v661_v28  ;;  %v666_v30 = vsel %vm216_vm8, %v2373_v27, -inf }
 0x2b6   :  { %667 = vmax.xlane.f32.xlu0 %v666_v30 }
 0x2b7   :  { %v669_v31 = vsel %vm216_vm8, %v665_v29, -inf }
 0x2b8   :  { %670 = vmax.xlane.f32.xlu1 %v669_v31  ;;  %535 = vmax.xlane.f32.xlu2 %v534_v32 }
 0x2c0   :  { %406 = vmax.xlane.f32.xlu1 %v405_v34 }
 0x2ca   :  { %1956 = vrot.lane.b32.xlu0 %v1955_v35, %s2868_s8 }
 0x2d9   :  { %1951 = vrot.lane.b32.xlu1 %v1955_v35, %s2871_s5  ;;  %s2125_s5 = smov [#allocation2]  }
 0x2e1   :  { %556 = vrot.lane.b32.xlu1 %v2319_v55, %s2870_s9 }
 0x2f9   :  { %v272_v36 = vpop.xlane.xlu2 %271 }
 0x2fa   :  { %v276_v39 = vsub.f32 %v268_v12, %v272_v36 }
 0x2fc   :  { %v278_v41 = vmul.f32 1.442695, %v276_v39 }
 0x302   :  { %v275_v45 = vpop.xlane.xlu1 %274 }
 0x303   :  { %v277_v49 = vsub.f32 %v269_v15, %v275_v45 }
 0x305   :  { %v280_v51 = vmul.f32 1.442695, %v277_v49 }
 0x311   :  { %v404_v37 = vpop.xlane.xlu0 %403 }
 0x312   :  { %v408_v38 = vsub.f32 %v400_v18, %v404_v37 }
 0x314   :  { %v410_v40 = vmul.f32 1.442695, %v408_v38 }
 0x316   :  { %2004 = vpow2.f32 %v410_v40 }
 0x317   :  { %2006 = vpow2.f32 %v278_v41 }
 0x31c   :  { %v2386_v42 = vpop.eup %2004 }
 0x31d   :  { %v414_v43 = vsel %vm216_vm8, %v2386_v42, 0.0  ;;  %v2007_v44 = vpop.eup %2006 }
 0x31e   :  { %415 = vadd.xlane.f32.xlu0 %v414_v43  ;;  %v282_v48 = vsel %vm216_vm8, %v2007_v44, 0.0 }
 0x323   :  { %v539_v46 = vpop.xlane.xlu2 %538 }
 0x324   :  { %v541_v47 = vsub.f32 %v533_v23, %v539_v46 }
 0x326   :  { %v544_v50 = vmul.f32 1.442695, %v541_v47  ;;  %283 = vadd.xlane.f32.xlu0 %v282_v48 }
 0x328   :  { %2008 = vpow2.f32 %v544_v50 }
 0x329   :  { %2010 = vpow2.f32 %v280_v51  ;;  %v668_v62 = vpop.xlane.xlu0 %667 }
 0x32a   :  { %v672_v12 = vsub.f32 %v2373_v27, %v668_v62 }
 0x32b   :  { %v671_v52 = vpop.xlane.xlu1 %670  ;;  %v536_v59 = vpop.xlane.xlu2 %535 }
 0x32c   :  { %v673_v53 = vsub.f32 %v665_v29, %v671_v52  ;;  %v540_v3 = vsub.f32 %v532_v26, %v536_v59  ;;  %v674_v14 = vmul.f32 1.442695, %v672_v12 }
 0x32e   :  { %v2391_v54 = vpop.eup %2008  ;;  %v676_v56 = vmul.f32 1.442695, %v673_v53  ;;  %v542_v7 = vmul.f32 1.442695, %v540_v3 }
 0x32f   :  { %v549_v58 = vsel %vm216_vm8, %v2391_v54, 0.0  ;;  %v2011_v61 = vpop.eup %2010 }
 0x330   :  { %2012 = vpow2.f32 %v676_v56  ;;  %550 = vadd.xlane.f32.xlu2 %v549_v58  ;;  %v285_v6 = vsel %vm216_vm8, %v2011_v61, 0.0 }
 0x333   :  { %v407_v60 = vpop.xlane.xlu1 %406 }
 0x334   :  { %v409_v63 = vsub.f32 %v401_v33, %v407_v60 }
 0x336   :  { %v2395_v1 = vpop.eup %2012  ;;  %v412_v4 = vmul.f32 1.442695, %v409_v63 }
 0x337   :  { %v681_v5 = vsel %vm216_vm8, %v2395_v1, 0.0 }
 0x338   :  { %2014 = vpow2.f32 %v412_v4  ;;  %682 = vadd.xlane.f32.xlu1 %v681_v5  ;;  %286 = vadd.xlane.f32.xlu2 %v285_v6 }
 0x339   :  { %2016 = vpow2.f32 %v542_v7 }
 0x33a   :  { %688 = vrot.lane.b32.xlu0 %v2319_v55, %s2869_s30  ;;  %2018 = vpow2.f32 %v674_v14  ;;  %v1983_v14 = vld [vmem:[%s2901_s4] ss:$0 sm:$0xff]  ;;  %s2905_s4 = sld [smem:[#allocation13_spill]] }
 0x33c   :  { %v1957_v8 = vpop.permute.xlu0 %1956 }
 0x33d   :  { %v1959_v9 = vunpack.i.h.bf16 %v1957_v8  ;;  %v1958_v25 = vunpack.i.l.bf16 %v1957_v8 }
 0x33e   :  { %v2015_v11 = vpop.eup %2014 }
 0x33f   :  { %471 = vmatpush.msrb.mxu1 %v1959_v9  ;;  %v417_v13 = vsel %vm216_vm8, %v2015_v11, 0.0  ;;  %v2017_v15 = vpop.eup %2016 }
 0x340   :  { %418 = vadd.xlane.f32.xlu2 %v417_v13  ;;  %v546_v16 = vsel %vm216_vm8, %v2017_v15, 0.0  ;;  %v2019_v17 = vpop.eup %2018 }
 0x341   :  { %v678_v20 = vsel %vm216_vm8, %v2019_v17, 0.0 }
 0x342   :  { %714 = vrot.lane.b32.xlu0 %v2323_v57, %s2869_s30  ;;  %s2900_s30 = sld [smem:[#allocation8_spill]] }
 0x348   :  { %547 = vadd.xlane.f32.xlu2 %v546_v16  ;;  %v99_v59 = vld [vmem:[%s2900_s30 + $0x18] sm:$0xff]  ;;  %v98_v60 = vld [vmem:[%s2900_s30 + $0x10] sm:$0xff]  ;;  %v96_v62 = vld [vmem:[%s2900_s30] sm:$0xff] }
 0x349   :  { %790 = vmatpush.msrb.mxu2 %v99_v59 }
 0x34b   :  { %v1952_v55 = vpop.permute.xlu1 %1951  ;;  %791 = vmatpush.msrb.mxu2 %v98_v60 }
 0x34c   :  { %v1953_v18 = vunpack.i.l.bf16 %v1952_v55  ;;  %v1954_v19 = vunpack.i.h.bf16 %v1952_v55 }
 0x34e   :  { %313 = vmatpush.msra.mxu3 %v1953_v18 }
 0x350   :  { %339 = vmatpush.msrb.mxu3 %v1954_v19  ;;  %679 = vadd.xlane.f32.xlu2 %v678_v20 }
 0x353   :  { %v557_v31 = vpop.permute.xlu1 %556 }
 0x368   :  { %582 = vrot.lane.b32.xlu2 %v2323_v57, %s2870_s9  ;;  %s2902_s9 = sld [smem:[#allocation14_spill]] }
 0x391   :  { %v416_v21 = vpop.xlane.xlu0 %415 }
 0x399   :  { %v284_v22 = vpop.xlane.xlu0 %283 }
 0x39a   :  { %2020 = vrcp.f32 %v284_v22 }
 0x3a0   :  { %v2021_v23 = vpop.eup %2020 }
 0x3a1   :  { %v290_v24 = vmul.f32 %v2021_v23, %v2007_v44 }
 0x3a3   :  { %1875 = vmatmul.msk.f32.vlgmr.msra.gmra.mxu3 %vm216_vm8, %v290_v24  ;;  %v551_v26 = vpop.xlane.xlu2 %550 }
 0x3a4   :  { %445 = vmatpush.msra.mxu3 %v1958_v25 }
 0x3ab   :  { %v287_v27 = vpop.xlane.xlu2 %286  ;;  %v683_v40 = vpop.xlane.xlu1 %682 }
 0x3ac   :  { %2022 = vrcp.f32 %v287_v27  ;;  %v689_v36 = vpop.permute.xlu0 %688 }
 0x3ad   :  { %2024 = vrcp.f32 %v416_v21 }
 0x3b2   :  { %v2023_v28 = vpop.eup %2022 }
 0x3b3   :  { %v419_v29 = vpop.xlane.xlu2 %418  ;;  %v291_v30 = vmul.f32 %v2023_v28, %v2011_v61  ;;  %v2025_v57 = vpop.eup %2024  ;;  %v97_v61 = vld [vmem:[%s2900_s30 + $0x8] sm:$0xff]  ;;  %s2903_s30 = sld [smem:[#allocation16_spill]] }
 0x3b4   :  { %2026 = vrcp.f32 %v419_v29  ;;  %v422_v35 = vmul.f32 %v2025_v57, %v2386_v42  ;;  %v715_v46 = vpop.permute.xlu0 %714  ;;  %792 = vmatpush.msrb.mxu2 %v97_v61  ;;  %v106_v57 = vld [vmem:[%s2902_s9 + $0x8] sm:$0xff] }
 0x3b5   :  { %1876 = vmatmul.msk.f32.vlgmr.msrb.gmra.mxu3 %vm216_vm8, %v291_v30  ;;  %v108_v30 = vld [vmem:[%s2902_s9 + $0x18] sm:$0xff] }
 0x3b6   :  { %577 = vmatpush.msrb.mxu3 %v557_v31  ;;  %793 = vmatpush.msrb.mxu2 %v96_v62  ;;  %v107_v31 = vld [vmem:[%s2902_s9 + $0x10] sm:$0xff] }
 0x3b7   :  { %883 = vmatpush.msrb.mxu0 %v108_v30 }
 0x3b9   :  { %884 = vmatpush.msrb.mxu0 %v107_v31 }
 0x3ba   :  { %v2027_v32 = vpop.eup %2026 }
 0x3bb   :  { %v548_v33 = vpop.xlane.xlu2 %547  ;;  %v423_v34 = vmul.f32 %v2027_v32, %v2015_v11  ;;  %885 = vmatpush.msrb.mxu0 %v106_v57  ;;  %v105_v32 = vld [vmem:[%s2902_s9] sm:$0xff]  ;;  %s2916_s9 = smov 24  }
 0x3bc   :  { %2028 = vrcp.f32 %v548_v33 }
 0x3bd   :  { %1882 = vmatmul.msk.f32.vlgmr.msrb.gmra.mxu1 %vm216_vm8, %v423_v34  ;;  %1881 = vmatmul.msk.f32.vlgmr.msra.gmra.mxu3 %vm216_vm8, %v422_v35  ;;  %2030 = vrcp.f32 %v551_v26 }
 0x3be   :  { %709 = vmatpush.msra.mxu3 %v689_v36  ;;  %886 = vmatpush.msrb.mxu0 %v105_v32  ;;  %v936_v32 = vld [vmem:[%s2847_s13 + $0x18] sm:$0xff] }
 0x3c2   :  { %v2029_v37 = vpop.eup %2028 }
 0x3c3   :  { %v554_v38 = vmul.f32 %v2029_v37, %v2017_v15  ;;  %v680_v39 = vpop.xlane.xlu2 %679  ;;  %v2031_v41 = vpop.eup %2030 }
 0x3c4   :  { %2032 = vrcp.f32 %v680_v39  ;;  %v555_v42 = vmul.f32 %v2031_v41, %v2391_v54  ;;  %v116_v39 = vld [vmem:[%s2903_s30 + $0x30] sm:$0xff]  ;;  %v115_v41 = vld [vmem:[%s2903_s30 + $0x28] sm:$0xff] }
 0x3c5   :  { %1887 = vmatmul.msk.f32.vlgmr.msrb.gmra.mxu3 %vm216_vm8, %v554_v38  ;;  %2034 = vrcp.f32 %v683_v40  ;;  %v117_v38 = vld [vmem:[%s2903_s30 + $0x38] sm:$0xff] }
 0x3c6   :  { %911 = vmatpush.msrb.mxu3 %v117_v38 }
 0x3c8   :  { %912 = vmatpush.msrb.mxu3 %v116_v39 }
 0x3ca   :  { %v2033_v43 = vpop.eup %2032  ;;  %913 = vmatpush.msrb.mxu3 %v115_v41 }
 0x3cb   :  { %v686_v44 = vmul.f32 %v2033_v43, %v2019_v17  ;;  %v583_v45 = vpop.permute.xlu2 %582  ;;  %v2035_v47 = vpop.eup %2034 }
 0x3cc   :  { %603 = vmatpush.msra.mxu1 %v583_v45  ;;  %v687_v48 = vmul.f32 %v2035_v47, %v2395_v1  ;;  %v114_v45 = vld [vmem:[%s2903_s30 + $0x20] sm:$0xff] }
 0x3cd   :  { %1888 = vmatmul.msk.f32.vlgmr.msra.gmra.mxu1 %vm216_vm8, %v555_v42  ;;  %1893 = vmatmul.msk.f32.vlgmr.msra.gmra.mxu3 %vm216_vm8, %v686_v44 }
 0x3ce   :  { %735 = vmatpush.msrb.mxu1 %v715_v46  ;;  %914 = vmatpush.msrb.mxu3 %v114_v45 }
 0x3d0   :  { %1036 = vmatpush.msra.mxu1 %v936_v32 }
 0x3d5   :  { %1894 = vmatmul.msk.f32.vlgmr.msrb.gmra.mxu1 %vm216_vm8, %v687_v48  ;;  %v113_v48 = vld [vmem:[%s2903_s30 + $0x18] sm:$0xff] }
 0x3d6   :  { %915 = vmatpush.msrb.mxu3 %v113_v48  ;;  %v1988_v48 = vld [vmem:[%s2851_s17] ss:$0 sm:$0xff]  ;;  %s1853_s17 = sshll.u32 %s2861_s27, 4  ;;  %s1854_s17 = int_to_ptr.hbm [resolvable:$true] %s1853_s17 }
 0x426   :  { %v315_v49 = vpop.f32.mrf.mxu3 }
 0x438   :  { %v341_v50 = vpop.f32.mrf.mxu3 }
 0x43a   :  { %v473_v52 = vpop.f32.mrf.mxu1 }
 0x440   :  { %v447_v51 = vpop.f32.mrf.mxu3 }
 0x441   :  { %742 = vrot.lane.b32.xlu0 %v447_v51, %s2876_s3 }
 0x448   :  { %v579_v53 = vpop.f32.mrf.mxu3 }
 0x449   :  { %750 = vrot.lane.b32.xlu0 %v579_v53, %s2123_s6  ;;  %v1985_v53 = vld [vmem:[%s2905_s4] ss:$0 sm:$0xff] }
 0x44a   :  { %v605_v54 = vpop.f32.mrf.mxu1 }
 0x450   :  { %v711_v56 = vpop.f32.mrf.mxu3 }
 0x451   :  { %744 = vrot.lane.b32.xlu0 %v473_v52, %s2876_s3  ;;  %758 = vrot.lane.b32.xlu2 %v711_v56, %s2880_s10  ;;  %s2907_s3 = sld [smem:[#allocation17_spill]] }
 0x452   :  { %v737_v58 = vpop.f32.mrf.mxu1 }
 0x459   :  { %752 = vrot.lane.b32.xlu2 %v605_v54, %s2123_s6  ;;  %760 = vrot.lane.b32.xlu0 %v737_v58, %s2880_s10  ;;  %s2906_s10 = sld [smem:[#allocation15_spill]] }
 0x4ab   :  { %v759_v4 = vpop.permute.xlu2 %758 }
 0x4b3   :  { %v743_v63 = vpop.permute.xlu0 %742  ;;  %v753_v9 = vpop.permute.xlu2 %752 }
 0x4b4   :  { %v764_v1 = vsel %vm216_vm8, %v315_v49, %v743_v63 }
 0x4bb   :  { %v751_v3 = vpop.permute.xlu0 %750 }
 0x4bc   :  { %v767_v5 = vsel %vm766_vm9, %v764_v1, %v751_v3 }
 0x4bd   :  { %v770_v6 = vsel %vm769_vm10, %v767_v5, %v759_v4 }
 0x4be   :  { %1895 = vmatmul.msk.f32.vlgmr.msrb.gmra.mxu2 %vm119_vm0, %v770_v6  ;;  %v112_v6 = vld [vmem:[%s2903_s30 + $0x10] sm:$0xff] }
 0x4bf   :  { %916 = vmatpush.msrb.mxu3 %v112_v6 }
 0x4c3   :  { %v745_v7 = vpop.permute.xlu0 %744 }
 0x4c4   :  { %v765_v8 = vsel %vm216_vm8, %v341_v50, %v745_v7  ;;  %v1984_v50 = vld [vmem:[%s2904_s7] ss:$0 sm:$0xff]  ;;  %v111_v7 = vld [vmem:[%s2903_s30 + $0x8] sm:$0xff]  ;;  %s2915_s7 = smov 8  }
 0x4c5   :  { %v768_v12 = vsel %vm766_vm9, %v765_v8, %v753_v9  ;;  %917 = vmatpush.msrb.mxu3 %v111_v7  ;;  %v110_v8 = vld [vmem:[%s2903_s30] sm:$0xff]  ;;  %s2909_s30 = smov 80  }
 0x4c6   :  { %v1986_v9 = vld [vmem:[%s2906_s10] ss:$0 sm:$0xff] }
 0x4c7   :  { %918 = vmatpush.msrb.mxu3 %v110_v8 }
 0x4cb   :  { %v761_v11 = vpop.permute.xlu0 %760 }
 0x4cc   :  { %v771_v13 = vsel %vm769_vm10, %v768_v12, %v761_v11 }
 0x4cd   :  { %1896 = vmatmul.msk.f32.gmra.mxu2 %vm119_vm0, %v771_v13 }
 0x541   :  { %v795_v15 = vpop.f32.mrf.mxu2 }
 0x542   :  { %v801_v16 = vadd.f32 %v795_v15, %v2275_v0 }
 0x544   :  { %v2451_v55 = vadd.f32 %v1983_v14, %v801_v16 }
 0x546   :  { %v808_v17 = vsel %vm119_vm0, %v2451_v55, 0.0 }
 0x547   :  { %809 = vadd.xlane.f32.xlu1 %v808_v17  ;;  %v1987_v17 = vld [vmem:[%s2907_s3] ss:$0 sm:$0xff] }
 0x550   :  { %v798_v18 = vpop.f32.mrf.mxu2 }
 0x551   :  { %v802_v19 = vadd.f32 %v798_v18, %v2282_v2 }
 0x553   :  { %v2456_v20 = vadd.f32 %v1983_v14, %v802_v19 }
 0x555   :  { %v811_v21 = vsel %vm119_vm0, %v2456_v20, 0.0 }
 0x556   :  { %812 = vadd.xlane.f32.xlu2 %v811_v21 }
 0x5ba   :  { %v810_v22 = vpop.xlane.xlu1 %809 }
 0x5bb   :  { %v814_v23 = vmul.f32 %v810_v22, %v2286_v10 }
 0x5bd   :  { %v816_v0 = vsub.f32 %v2451_v55, %v814_v23 }
 0x5bf   :  { %v818_v24 = vmul.f32 %v816_v0, %v816_v0 }
 0x5c1   :  { %v820_v25 = vsel %vm119_vm0, %v818_v24, 0.0 }
 0x5c2   :  { %821 = vadd.xlane.f32.xlu0 %v820_v25 }
 0x5c9   :  { %v813_v26 = vpop.xlane.xlu2 %812 }
 0x5ca   :  { %v815_v27 = vmul.f32 %v813_v26, %v2286_v10 }
 0x5cc   :  { %v817_v2 = vsub.f32 %v2456_v20, %v815_v27 }
 0x5ce   :  { %v819_v28 = vmul.f32 %v817_v2, %v817_v2 }
 0x5d0   :  { %v823_v29 = vsel %vm119_vm0, %v819_v28, 0.0 }
 0x5d1   :  { %824 = vadd.xlane.f32.xlu1 %v823_v29 }
 0x635   :  { %v822_v33 = vpop.xlane.xlu0 %821 }
 0x636   :  { %v826_v34 = vmul.f32 %v822_v33, %v2286_v10  ;;  %v935_v33 = vld [vmem:[%s2847_s13 + $0x10] sm:$0xff] }
 0x637   :  { %1037 = vmatpush.msra.mxu1 %v935_v33 }
 0x638   :  { %v828_v35 = vadd.f32 1e-05, %v826_v34  ;;  %v934_v34 = vld [vmem:[%s2847_s13 + $0x8] sm:$0xff] }
 0x639   :  { %1038 = vmatpush.msra.mxu1 %v934_v34 }
 0x63a   :  { %2036 = vrsqrt.f32 %v828_v35  ;;  %vm836_vm12 = vweird.f32 %v828_v35 }
 0x640   :  { %v2037_v36 = vpop.eup %2036 }
 0x641   :  { %v831_v37 = vmul.f32 %v2037_v36, %v828_v35  ;;  %vm837_vm11 = vweird.f32 %v2037_v36  ;;  %v933_v35 = vld [vmem:[%s2847_s13] sm:$0xff] }
 0x642   :  { %vm838_vm13 = vmor %vm836_vm12, %vm837_vm11  ;;  %1039 = vmatpush.msra.mxu1 %v933_v35 }
 0x643   :  { %v832_v40 = vmul.f32 %v2037_v36, %v831_v37 }
 0x644   :  { %v825_v43 = vpop.xlane.xlu1 %824 }
 0x645   :  { %v833_v42 = vmul.f32 0.5, %v832_v40  ;;  %v827_v44 = vmul.f32 %v825_v43, %v2286_v10 }
 0x647   :  { %v834_v46 = vsub.f32 1.5, %v833_v42  ;;  %v829_v47 = vadd.f32 1e-05, %v827_v44 }
 0x649   :  { %v835_v49 = vmul.f32 %v2037_v36, %v834_v46  ;;  %2038 = vrsqrt.f32 %v829_v47  ;;  %vm846_vm15 = vweird.f32 %v829_v47 }
 0x64b   :  { %v839_v51 = vsel %vm838_vm13, %v2037_v36, %v835_v49 }
 0x64c   :  { %v850_v52 = vmul.f32 %v839_v51, %v816_v0  ;;  %v1989_v51 = vld [vmem:[%s2852_s18] ss:$0 sm:$0xff] }
 0x64e   :  { %v855_v54 = vmul.f32 %v1984_v50, %v850_v52 }
 0x64f   :  { %v2039_v56 = vpop.eup %2038 }
 0x650   :  { %v841_v58 = vmul.f32 %v2039_v56, %v829_v47  ;;  %v860_v59 = vadd.f32 %v1985_v53, %v855_v54  ;;  %vm847_vm14 = vweird.f32 %v2039_v56 }
 0x651   :  { %vm848_vm1 = vmor %vm846_vm15, %vm847_vm14 }
 0x652   :  { %v842_v60 = vmul.f32 %v2039_v56, %v841_v58  ;;  %1897 = vmatmul.msk.f32.vlgmr.msrb.gmra.mxu0 %vm119_vm0, %v860_v59 }
 0x654   :  { %v843_v61 = vmul.f32 0.5, %v842_v60 }
 0x656   :  { %v844_v62 = vsub.f32 1.5, %v843_v61 }
 0x658   :  { %v845_v63 = vmul.f32 %v2039_v56, %v844_v62 }
 0x65a   :  { %v849_v1 = vsel %vm848_vm1, %v2039_v56, %v845_v63 }
 0x65b   :  { %v851_v3 = vmul.f32 %v849_v1, %v817_v2 }
 0x65d   :  { %v856_v4 = vmul.f32 %v1984_v50, %v851_v3 }
 0x65f   :  { %v861_v5 = vadd.f32 %v1985_v53, %v856_v4  ;;  %v1990_v4 = vld [vmem:[%s2848_s14] ss:$0 sm:$0xff]  ;;  %s2908_s14 = smov 72  }
 0x661   :  { %1898 = vmatmul.msk.f32.gmra.mxu0 %vm119_vm0, %v861_v5 }
 0x6cf   :  { %v888_v11 = vpop.f32.mrf.mxu0 }
 0x6d0   :  { %v889_v12 = vadd.f32 %v1986_v9, %v888_v11 }
 0x6d2   :  { %v894_v13 = vmax.f32 %v889_v12, 0.0 }
 0x6d4   :  { %1899 = vmatmul.msk.f32.vlgmr.msrb.gmra.mxu3 %vm896_vm2, %v894_v13 }
 0x6de   :  { %v891_v14 = vpop.f32.mrf.mxu0 }
 0x6df   :  { %v892_v15 = vadd.f32 %v1986_v9, %v891_v14 }
 0x6e1   :  { %v895_v16 = vmax.f32 %v892_v15, 0.0 }
 0x6e3   :  { %1900 = vmatmul.msk.f32.gmra.mxu3 %vm896_vm2, %v895_v16 }
 0x757   :  { %v920_v18 = vpop.f32.mrf.mxu3 }
 0x758   :  { %v926_v19 = vadd.f32 %v920_v18, %v2451_v55 }
 0x75a   :  { %v2521_v21 = vadd.f32 %v1987_v17, %v926_v19 }
 0x75c   :  { %v961_v22 = vsel %vm119_vm0, %v2521_v21, 0.0 }
 0x75d   :  { %962 = vadd.xlane.f32.xlu1 %v961_v22 }
 0x766   :  { %v923_v23 = vpop.f32.mrf.mxu3 }
 0x767   :  { %v927_v0 = vadd.f32 %v923_v23, %v2456_v20 }
 0x769   :  { %v2526_v24 = vadd.f32 %v1987_v17, %v927_v0 }
 0x76b   :  { %v964_v25 = vsel %vm119_vm0, %v2526_v24, 0.0 }
 0x76c   :  { %965 = vadd.xlane.f32.xlu1 %v964_v25 }
 0x7d0   :  { %v963_v26 = vpop.xlane.xlu1 %962 }
 0x7d1   :  { %v967_v27 = vmul.f32 %v963_v26, %v2286_v10 }
 0x7d3   :  { %v969_v55 = vsub.f32 %v2521_v21, %v967_v27 }
 0x7d5   :  { %v971_v2 = vmul.f32 %v969_v55, %v969_v55 }
 0x7d7   :  { %v973_v28 = vsel %vm119_vm0, %v971_v2, 0.0 }
 0x7d8   :  { %974 = vadd.xlane.f32.xlu1 %v973_v28 }
 0x7df   :  { %v966_v29 = vpop.xlane.xlu1 %965 }
 0x7e0   :  { %v968_v30 = vmul.f32 %v966_v29, %v2286_v10 }
 0x7e2   :  { %v970_v20 = vsub.f32 %v2526_v24, %v968_v30 }
 0x7e4   :  { %v972_v31 = vmul.f32 %v970_v20, %v970_v20 }
 0x7e6   :  { %v976_v57 = vsel %vm119_vm0, %v972_v31, 0.0 }
 0x7e7   :  { %977 = vadd.xlane.f32.xlu1 %v976_v57 }
 0x84b   :  { %v975_v36 = vpop.xlane.xlu1 %974 }
 0x84c   :  { %v979_v37 = vmul.f32 %v975_v36, %v2286_v10 }
 0x84e   :  { %v981_v38 = vadd.f32 1e-05, %v979_v37 }
 0x850   :  { %2040 = vrsqrt.f32 %v981_v38  ;;  %vm989_vm4 = vweird.f32 %v981_v38 }
 0x856   :  { %v2041_v39 = vpop.eup %2040 }
 0x857   :  { %v984_v40 = vmul.f32 %v2041_v39, %v981_v38  ;;  %vm990_vm3 = vweird.f32 %v2041_v39 }
 0x858   :  { %vm991_vm5 = vmor %vm989_vm4, %vm990_vm3 }
 0x859   :  { %v985_v41 = vmul.f32 %v2041_v39, %v984_v40 }
 0x85a   :  { %v978_v43 = vpop.xlane.xlu1 %977 }
 0x85b   :  { %v986_v42 = vmul.f32 0.5, %v985_v41  ;;  %v980_v44 = vmul.f32 %v978_v43, %v2286_v10 }
 0x85d   :  { %v987_v45 = vsub.f32 1.5, %v986_v42  ;;  %v982_v46 = vadd.f32 1e-05, %v980_v44 }
 0x85f   :  { %v988_v47 = vmul.f32 %v2041_v39, %v987_v45  ;;  %2042 = vrsqrt.f32 %v982_v46  ;;  %vm999_vm7 = vweird.f32 %v982_v46 }
 0x861   :  { %v992_v49 = vsel %vm991_vm5, %v2041_v39, %v988_v47 }
 0x862   :  { %v1003_v50 = vmul.f32 %v992_v49, %v969_v55 }
 0x864   :  { %v1008_v52 = vmul.f32 %v1988_v48, %v1003_v50 }
 0x865   :  { %v2043_v53 = vpop.eup %2042 }
 0x866   :  { %v994_v54 = vmul.f32 %v2043_v53, %v982_v46  ;;  %v1013_v56 = vadd.f32 %v1989_v51, %v1008_v52  ;;  %vm1000_vm6 = vweird.f32 %v2043_v53 }
 0x867   :  { %vm1001_vm11 = vmor %vm999_vm7, %vm1000_vm6 }
 0x868   :  { %v995_v58 = vmul.f32 %v2043_v53, %v994_v54  ;;  %1901 = vmatmul.msk.f32.vlgmr.msra.gmra.mxu1 %vm119_vm0, %v1013_v56 }
 0x86a   :  { %v996_v59 = vmul.f32 0.5, %v995_v58 }
 0x86c   :  { %v997_v60 = vsub.f32 1.5, %v996_v59 }
 0x86e   :  { %v998_v61 = vmul.f32 %v2043_v53, %v997_v60 }
 0x870   :  { %v1002_v62 = vsel %vm1001_vm11, %v2043_v53, %v998_v61 }
 0x871   :  { %v1004_v63 = vmul.f32 %v1002_v62, %v970_v20 }
 0x873   :  { %v1009_v1 = vmul.f32 %v1988_v48, %v1004_v63 }
 0x875   :  { %v1014_v3 = vadd.f32 %v1989_v51, %v1009_v1 }
 0x877   :  { %1902 = vmatmul.msk.f32.gmra.mxu1 %vm119_vm0, %v1014_v3 }
 0x8e5   :  { %v1041_v5 = vpop.f32.mrf.mxu1 }
 0x8e6   :  { %v2561_v6 = vadd.f32 %v1990_v4, %v1041_v5 }
 0x8e8   :  { %1048 = vrot.lane.b32.xlu2 %v2561_v6, %s2111_s11 }
 0x8f0   :  { %1179 = vrot.lane.b32.xlu2 %v2561_v6, %s2113_s2 }
 0x8f4   :  { %v1044_v7 = vpop.f32.mrf.mxu1 }
 0x8f5   :  { %v2567_v8 = vadd.f32 %v1990_v4, %v1044_v7 }
 0x8f7   :  { %1207 = vrot.lane.b32.xlu1 %v2567_v8, %s2113_s2  ;;  %1075 = vrot.lane.b32.xlu0 %v2567_v8, %s2111_s11  ;;  %s2910_s2 = smov 104   ;;  %v1960_v46 = vpack.i.bf16 %v2567_v8, %v2561_v6  ;;  %s2911_s11 = smov 64  }
 0x8f8   :  { %1337 = vrot.lane.b32.xlu2 %v2567_v8, %s2115_s12 }
 0x8ff   :  { %1177 = vrot.lane.b32.xlu1 %v2561_v6, %s2112_s29  ;;  %1205 = vrot.lane.b32.xlu0 %v2567_v8, %s2112_s29  ;;  %s2912_s29 = smov 48  }
 0x900   :  { %1471 = vrot.lane.b32.xlu2 %v2567_v8, %s2908_s14 }
 0x907   :  { %1311 = vrot.lane.b32.xlu1 %v2561_v6, %s2909_s30  ;;  %1339 = vrot.lane.b32.xlu0 %v2567_v8, %s2909_s30 }
 0x908   :  { %1441 = vrot.lane.b32.xlu2 %v2561_v6, %s2910_s2 }
 0x90f   :  { %1469 = vrot.lane.b32.xlu1 %v2567_v8, %s2910_s2  ;;  %1309 = vrot.lane.b32.xlu0 %v2561_v6, %s2115_s12  ;;  %s2913_s12 = smov 40  }
 0x917   :  { %1443 = vrot.lane.b32.xlu0 %v2561_v6, %s2908_s14 }
 0x942   :  { %v1049_v9 = vpop.permute.xlu2 %1048 }
 0x943   :  { %1903 = vmatpush.xpose.msk.msra.mxu2 %vm216_vm8, %v1049_v9 }
 0x946   :  { %1904 = vmatmul.msk.f32.vlgmr.msra.gmra.mxu2 %vm216_vm8, %v2561_v6 }
 0x94a   :  { %v1180_v11 = vpop.permute.xlu2 %1179 }
 0x952   :  { %v1338_v14 = vpop.permute.xlu2 %1337 }
 0x95a   :  { %v1472_v19 = vpop.permute.xlu2 %1471 }
 0x962   :  { %v1442_v25 = vpop.permute.xlu2 %1441 }
 0x969   :  { %v1208_v12 = vpop.permute.xlu1 %1207  ;;  %v1076_v13 = vpop.permute.xlu0 %1075 }
 0x96a   :  { %1905 = vmatpush.xpose.msk.msra.mxu0 %vm216_vm8, %v1076_v13  ;;  %1911 = vmatpush.xpose.msk.msra.mxu3 %vm216_vm8, %v1208_v12 }
 0x96d   :  { %1906 = vmatmul.msk.f32.vlgmr.msra.gmra.mxu0 %vm216_vm8, %v2567_v8 }
 0x96e   :  { %1909 = vmatpush.xpose.msk.msrb.mxu0 %vm216_vm8, %v1180_v11 }
 0x971   :  { %v1178_v15 = vpop.permute.xlu1 %1177  ;;  %v1206_v16 = vpop.permute.xlu0 %1205 }
 0x972   :  { %1912 = vmatmul.msk.f32.vlgmr.msra.gmra.mxu3 %vm216_vm8, %v1206_v16 }
 0x975   :  { %1910 = vmatmul.msk.f32.vlgmr.msrb.gmra.mxu0 %vm216_vm8, %v1178_v15 }
 0x979   :  { %v1312_v17 = vpop.permute.xlu1 %1311  ;;  %v1340_v18 = vpop.permute.xlu0 %1339 }
 0x97a   :  { %1915 = vmatpush.xpose.msk.msra.mxu0 %vm216_vm8, %v1312_v17  ;;  %1917 = vmatpush.xpose.msk.msrb.mxu3 %vm216_vm8, %v1340_v18 }
 0x97d   :  { %1918 = vmatmul.msk.f32.vlgmr.msrb.gmra.mxu3 %vm216_vm8, %v1338_v14 }
 0x97e   :  { %1923 = vmatpush.xpose.msk.msra.mxu3 %vm216_vm8, %v1472_v19 }
 0x981   :  { %v1310_v22 = vpop.permute.xlu0 %1309  ;;  %v1470_v23 = vpop.permute.xlu1 %1469 }
 0x982   :  { %1916 = vmatmul.msk.f32.vlgmr.msra.gmra.mxu0 %vm216_vm8, %v1310_v22 }
 0x985   :  { %1924 = vmatmul.msk.f32.vlgmr.msra.gmra.mxu3 %vm216_vm8, %v1470_v23 }
 0x989   :  { %v1444_v0 = vpop.permute.xlu0 %1443 }
 0x98a   :  { %1921 = vmatpush.xpose.msk.msrb.mxu0 %vm216_vm8, %v1444_v0 }
 0x98d   :  { %1922 = vmatmul.msk.f32.vlgmr.msrb.gmra.mxu0 %vm216_vm8, %v1442_v25 }
 0x9c9   :  { %v1071_v26 = vpop.f32.mrf.mxu2 }
 0x9ca   :  { %v1101_v27 = vmul.f32 0.35355338, %v1071_v26 }
 0x9cc   :  { %v1103_v55 = vsel %vm216_vm8, %v1101_v27, -inf }
 0x9cd   :  { %1104 = vmax.xlane.f32.xlu1 %v1103_v55 }
 0x9ea   :  { %v1098_v2 = vpop.f32.mrf.mxu0 }
 0x9eb   :  { %v1102_v28 = vmul.f32 0.35355338, %v1098_v2 }
 0x9ed   :  { %v1106_v29 = vsel %vm216_vm8, %v1102_v28, -inf }
 0x9ee   :  { %1107 = vmax.xlane.f32.xlu0 %v1106_v29 }
 0x9f2   :  { %v1202_v30 = vpop.f32.mrf.mxu0 }
 0x9f3   :  { %v1233_v20 = vmul.f32 0.35355338, %v1202_v30 }
 0x9f5   :  { %v1230_v31 = vpop.f32.mrf.mxu3  ;;  %v1235_v57 = vsel %vm216_vm8, %v1233_v20, -inf }
 0x9f6   :  { %v1234_v32 = vmul.f32 0.35355338, %v1230_v31  ;;  %1236 = vmax.xlane.f32.xlu2 %v1235_v57 }
 0x9f8   :  { %v1238_v33 = vsel %vm216_vm8, %v1234_v32, -inf }
 0x9f9   :  { %1239 = vmax.xlane.f32.xlu1 %v1238_v33 }
 0x9ff   :  { %v1334_v34 = vpop.f32.mrf.mxu0 }
 0xa00   :  { %v1365_v35 = vmul.f32 0.35355338, %v1334_v34  ;;  %v1362_v36 = vpop.f32.mrf.mxu3 }
 0xa01   :  { %v1366_v37 = vmul.f32 0.35355338, %v1362_v36 }
 0xa02   :  { %v1367_v38 = vsel %vm216_vm8, %v1365_v35, -inf }
 0xa03   :  { %1368 = vmax.xlane.f32.xlu0 %v1367_v38  ;;  %v1370_v39 = vsel %vm216_vm8, %v1366_v37, -inf }
 0xa04   :  { %1371 = vmax.xlane.f32.xlu2 %v1370_v39 }
 0xa08   :  { %v1494_v40 = vpop.f32.mrf.mxu3 }
 0xa09   :  { %v2617_v41 = vmul.f32 0.35355338, %v1494_v40 }
 0xa0a   :  { %v1466_v43 = vpop.f32.mrf.mxu0 }
 0xa0b   :  { %v1497_v42 = vmul.f32 0.35355338, %v1466_v43  ;;  %v1502_v44 = vsel %vm216_vm8, %v2617_v41, -inf }
 0xa0c   :  { %1503 = vmax.xlane.f32.xlu0 %v1502_v44 }
 0xa0d   :  { %v1499_v45 = vsel %vm216_vm8, %v1497_v42, -inf }
 0xa0e   :  { %1500 = vmax.xlane.f32.xlu1 %v1499_v45 }
 0xa1c   :  { %1961 = vrot.lane.b32.xlu2 %v1960_v46, %s2911_s11 }
 0xa40   :  { %v1105_v47 = vpop.xlane.xlu1 %1104 }
 0xa41   :  { %v1109_v48 = vsub.f32 %v1101_v27, %v1105_v47 }
 0xa43   :  { %v1111_v49 = vmul.f32 1.442695, %v1109_v48 }
 0xa45   :  { %2044 = vpow2.f32 %v1111_v49 }
 0xa4b   :  { %v2625_v50 = vpop.eup %2044 }
 0xa4c   :  { %v1115_v51 = vsel %vm216_vm8, %v2625_v50, 0.0 }
 0xa4d   :  { %1116 = vadd.xlane.f32.xlu2 %v1115_v51 }
 0xa61   :  { %v1108_v52 = vpop.xlane.xlu0 %1107 }
 0xa62   :  { %v1110_v53 = vsub.f32 %v1102_v28, %v1108_v52 }
 0xa64   :  { %v1113_v54 = vmul.f32 1.442695, %v1110_v53 }
 0xa65   :  { %1971 = vrot.lane.b32.xlu2 %v1960_v46, %s2912_s29 }
 0xa66   :  { %2046 = vpow2.f32 %v1113_v54 }
 0xa69   :  { %v1237_v56 = vpop.xlane.xlu2 %1236 }
 0xa6a   :  { %v1241_v58 = vsub.f32 %v1233_v20, %v1237_v56 }
 0xa6c   :  { %v2047_v59 = vpop.eup %2046  ;;  %v1243_v60 = vmul.f32 1.442695, %v1241_v58  ;;  %v1240_v61 = vpop.xlane.xlu1 %1239 }
 0xa6d   :  { %v1242_v62 = vsub.f32 %v1234_v32, %v1240_v61  ;;  %1976 = vrot.lane.b32.xlu2 %v1960_v46, %s2913_s12  ;;  %v1118_v63 = vsel %vm216_vm8, %v2047_v59, 0.0 }
 0xa6e   :  { %2048 = vpow2.f32 %v1243_v60  ;;  %1119 = vadd.xlane.f32.xlu1 %v1118_v63 }
 0xa6f   :  { %v1245_v1 = vmul.f32 1.442695, %v1242_v62 }
 0xa71   :  { %2050 = vpow2.f32 %v1245_v1 }
 0xa74   :  { %v2632_v3 = vpop.eup %2048 }
 0xa75   :  { %v1247_v4 = vsel %vm216_vm8, %v2632_v3, 0.0 }
 0xa76   :  { %1248 = vadd.xlane.f32.xlu0 %v1247_v4  ;;  %v1369_v6 = vpop.xlane.xlu0 %1368 }
 0xa77   :  { %v2636_v5 = vpop.eup %2050  ;;  %v1372_v7 = vpop.xlane.xlu2 %1371  ;;  %v1373_v11 = vsub.f32 %v1365_v35, %v1369_v6 }
 0xa78   :  { %v1374_v8 = vsub.f32 %v1366_v37, %v1372_v7  ;;  %v1250_v9 = vsel %vm216_vm8, %v2636_v5, 0.0 }
 0xa79   :  { %1251 = vadd.xlane.f32.xlu1 %v1250_v9  ;;  %v1375_v13 = vmul.f32 1.442695, %v1373_v11  ;;  %v941_v11 = vld [vmem:[%s2849_s15 + $0x18] sm:$0xff] }
 0xa7a   :  { %v1377_v12 = vmul.f32 1.442695, %v1374_v8  ;;  %1647 = vmatpush.msra.mxu0 %v941_v11  ;;  %v1992_v11 = vld [vmem:[%s2853_s19] ss:$0 sm:$0xff] }
 0xa7c   :  { %2052 = vpow2.f32 %v1377_v12  ;;  %v940_v12 = vld [vmem:[%s2849_s15 + $0x10] sm:$0xff] }
 0xa7d   :  { %2054 = vpow2.f32 %v1375_v13  ;;  %v939_v13 = vld [vmem:[%s2849_s15 + $0x8] sm:$0xff]  ;;  %1648 = vmatpush.msra.mxu0 %v940_v12 }
 0xa7f   :  { %v1962_v14 = vpop.permute.xlu2 %1961  ;;  %v1504_v0 = vpop.xlane.xlu0 %1503  ;;  %1649 = vmatpush.msra.mxu0 %v939_v13 }
 0xa80   :  { %v1964_v15 = vunpack.i.h.bf16 %v1962_v14  ;;  %v1963_v16 = vunpack.i.l.bf16 %v1962_v14  ;;  %v1506_v26 = vsub.f32 %v2617_v41, %v1504_v0  ;;  %v938_v14 = vld [vmem:[%s2849_s15] sm:$0xff]  ;;  %s2126_s15 = smov 128  }
 0xa81   :  { %v1501_v17 = vpop.xlane.xlu1 %1500  ;;  %1650 = vmatpush.msra.mxu0 %v938_v14  ;;  %v1993_v14 = vld [vmem:[%s2854_s20] ss:$0 sm:$0xff] }
 0xa82   :  { %v2640_v18 = vpop.eup %2052  ;;  %v1505_v19 = vsub.f32 %v1497_v42, %v1501_v17  ;;  %1146 = vmatpush.msrb.mxu1 %v1963_v16  ;;  %1172 = vmatpush.msrb.mxu2 %v1964_v15  ;;  %v1509_v55 = vmul.f32 1.442695, %v1506_v26 }
 0xa83   :  { %v1382_v22 = vsel %vm216_vm8, %v2640_v18, 0.0  ;;  %v2055_v25 = vpop.eup %2054 }
 0xa84   :  { %1383 = vadd.xlane.f32.xlu0 %v1382_v22  ;;  %v1507_v23 = vmul.f32 1.442695, %v1505_v19  ;;  %v1379_v27 = vsel %vm216_vm8, %v2055_v25, 0.0 }
 0xa86   :  { %2056 = vpow2.f32 %v1507_v23 }
 0xa87   :  { %2058 = vpow2.f32 %v1509_v55 }
 0xa8c   :  { %1380 = vadd.xlane.f32.xlu0 %v1379_v27  ;;  %v2057_v2 = vpop.eup %2056 }
 0xa8d   :  { %v1511_v28 = vsel %vm216_vm8, %v2057_v2, 0.0  ;;  %v2059_v29 = vpop.eup %2058 }
 0xa8e   :  { %v1514_v30 = vsel %vm216_vm8, %v2059_v29, 0.0 }
 0xa92   :  { %1966 = vrot.lane.b32.xlu1 %v1960_v46, %s2914_s0 }
 0xa94   :  { %1512 = vadd.xlane.f32.xlu0 %v1511_v28 }
 0xa9c   :  { %1515 = vadd.xlane.f32.xlu0 %v1514_v30 }
 0xac0   :  { %v1117_v20 = vpop.xlane.xlu2 %1116 }
 0xac1   :  { %2060 = vrcp.f32 %v1117_v20 }
 0xac7   :  { %v2061_v31 = vpop.eup %2060 }
 0xac8   :  { %v2650_v57 = vmul.f32 %v2061_v31, %v2625_v50  ;;  %v1972_v38 = vpop.permute.xlu2 %1971 }
 0xac9   :  { %v1974_v48 = vunpack.i.h.bf16 %v1972_v38  ;;  %v1973_v49 = vunpack.i.l.bf16 %v1972_v38 }
 0xaca   :  { %1907 = vmatmul.msk.f32.vlgmr.msrb.gmra.mxu1 %vm216_vm8, %v2650_v57 }
 0xad0   :  { %v1977_v42 = vpop.permute.xlu2 %1976 }
 0xad1   :  { %v1979_v51 = vunpack.i.h.bf16 %v1977_v42  ;;  %v1978_v52 = vunpack.i.l.bf16 %v1977_v42 }
 0xae1   :  { %v1120_v32 = vpop.xlane.xlu1 %1119 }
 0xae2   :  { %2062 = vrcp.f32 %v1120_v32 }
 0xae8   :  { %v2063_v33 = vpop.eup %2062 }
 0xae9   :  { %v2654_v34 = vmul.f32 %v2063_v33, %v2047_v59  ;;  %v1249_v35 = vpop.xlane.xlu0 %1248 }
 0xaea   :  { %2064 = vrcp.f32 %v1249_v35 }
 0xaeb   :  { %1908 = vmatmul.msk.f32.vlgmr.msrb.gmra.mxu2 %vm216_vm8, %v2654_v34 }
 0xaec   :  { %v1252_v37 = vpop.xlane.xlu1 %1251 }
 0xaed   :  { %2066 = vrcp.f32 %v1252_v37 }
 0xaf0   :  { %v2065_v40 = vpop.eup %2064 }
 0xaf1   :  { %v2659_v46 = vmul.f32 %v2065_v40, %v2632_v3 }
 0xaf3   :  { %v2067_v41 = vpop.eup %2066 }
 0xaf4   :  { %v2662_v47 = vmul.f32 %v2067_v41, %v2636_v5 }
 0xaf7   :  { %v1384_v36 = vpop.xlane.xlu0 %1383 }
 0xaf8   :  { %2068 = vrcp.f32 %v1384_v36 }
 0xafe   :  { %v2069_v53 = vpop.eup %2068 }
 0xaff   :  { %v1381_v39 = vpop.xlane.xlu0 %1380  ;;  %v2669_v56 = vmul.f32 %v2069_v53, %v2640_v18 }
 0xb00   :  { %2070 = vrcp.f32 %v1381_v39 }
 0xb04   :  { %v1967_v43 = vpop.permute.xlu1 %1966 }
 0xb05   :  { %v1969_v44 = vunpack.i.h.bf16 %v1967_v43  ;;  %v1968_v45 = vunpack.i.l.bf16 %v1967_v43 }
 0xb06   :  { %v2071_v54 = vpop.eup %2070 }
 0xb07   :  { %1278 = vmatpush.msra.mxu1 %v1968_v45  ;;  %1304 = vmatpush.msra.mxu2 %v1969_v44  ;;  %v1513_v50 = vpop.xlane.xlu0 %1512  ;;  %v2671_v58 = vmul.f32 %v2071_v54, %v2055_v25  ;;  %v950_v44 = vld [vmem:[%s2855_s21 + $0x18] sm:$0xff]  ;;  %v949_v45 = vld [vmem:[%s2855_s21 + $0x10] sm:$0xff] }
 0xb08   :  { %1913 = vmatmul.msk.f32.vlgmr.msra.gmra.mxu1 %vm216_vm8, %v2659_v46  ;;  %1914 = vmatmul.msk.f32.vlgmr.msra.gmra.mxu2 %vm216_vm8, %v2662_v47  ;;  %2072 = vrcp.f32 %v1513_v50  ;;  %v959_v54 = vld [vmem:[%s2857_s23 + $0x38] sm:$0xff] }
 0xb09   :  { %1410 = vmatpush.msrb.mxu1 %v1973_v49  ;;  %1436 = vmatpush.msrb.mxu2 %v1974_v48  ;;  %v948_v48 = vld [vmem:[%s2855_s21 + $0x8] sm:$0xff]  ;;  %v947_v49 = vld [vmem:[%s2855_s21] sm:$0xff]  ;;  %s1851_s21 = sshll.u32 %s2125_s5, 4  ;;  %s1852_s21 = int_to_ptr.vmem [resolvable:$true] %s1851_s21 }
 0xb0a   :  { %1740 = vmatpush.msrb.mxu3 %v950_v44 }
 0xb0b   :  { %1542 = vmatpush.msra.mxu1 %v1978_v52  ;;  %1568 = vmatpush.msra.mxu2 %v1979_v51 }
 0xb0c   :  { %1741 = vmatpush.msrb.mxu3 %v949_v45 }
 0xb0e   :  { %v2073_v60 = vpop.eup %2072  ;;  %1742 = vmatpush.msrb.mxu3 %v948_v48 }
 0xb0f   :  { %v1516_v59 = vpop.xlane.xlu0 %1515  ;;  %v2677_v62 = vmul.f32 %v2073_v60, %v2057_v2  ;;  %v1991_v2 = vld [vmem:[%s2850_s16] ss:$0 sm:$0xff] }
 0xb10   :  { %2074 = vrcp.f32 %v1516_v59  ;;  %1919 = vmatmul.msk.f32.vlgmr.msrb.gmra.mxu1 %vm216_vm8, %v2671_v58  ;;  %1920 = vmatmul.msk.f32.vlgmr.msrb.gmra.mxu2 %vm216_vm8, %v2669_v56  ;;  %v958_v59 = vld [vmem:[%s2857_s23 + $0x30] sm:$0xff] }
 0xb11   :  { %1743 = vmatpush.msrb.mxu3 %v947_v49  ;;  %1767 = vmatpush.msrb.mxu1 %v959_v54 }
 0xb13   :  { %1768 = vmatpush.msrb.mxu1 %v958_v59 }
 0xb16   :  { %v2075_v61 = vpop.eup %2074 }
 0xb17   :  { %v2679_v63 = vmul.f32 %v2075_v61, %v2059_v29  ;;  %v957_v61 = vld [vmem:[%s2857_s23 + $0x28] sm:$0xff] }
 0xb18   :  { %1925 = vmatmul.msk.f32.vlgmr.msra.gmra.mxu1 %vm216_vm8, %v2677_v62 }
 0xb19   :  { %1926 = vmatmul.msk.f32.vlgmr.msra.gmra.mxu2 %vm216_vm8, %v2679_v63  ;;  %1769 = vmatpush.msrb.mxu1 %v957_v61 }
 0xb47   :  { %v1148_v1 = vpop.f32.mrf.mxu1 }
 0xb6e   :  { %v1174_v3 = vpop.f32.mrf.mxu2 }
 0xb85   :  { %v1280_v4 = vpop.f32.mrf.mxu1 }
 0xb86   :  { %1601 = vrot.lane.b32.xlu0 %v1280_v4, %s2915_s7 }
 0xb8b   :  { %v1306_v5 = vpop.f32.mrf.mxu2 }
 0xb8d   :  { %v1412_v6 = vpop.f32.mrf.mxu1 }
 0xb8e   :  { %1609 = vrot.lane.b32.xlu1 %v1412_v6, %s2123_s6 }
 0xb93   :  { %v1438_v7 = vpop.f32.mrf.mxu2 }
 0xb95   :  { %v1544_v8 = vpop.f32.mrf.mxu1 }
 0xb96   :  { %1603 = vrot.lane.b32.xlu1 %v1306_v5, %s2915_s7  ;;  %1617 = vrot.lane.b32.xlu2 %v1544_v8, %s2916_s9  ;;  %v956_v5 = vld [vmem:[%s2857_s23 + $0x20] sm:$0xff]  ;;  %v955_v8 = vld [vmem:[%s2857_s23 + $0x18] sm:$0xff] }
 0xb97   :  { %1770 = vmatpush.msrb.mxu1 %v956_v5 }
 0xb99   :  { %1771 = vmatpush.msrb.mxu1 %v955_v8 }
 0xb9c   :  { %v1570_v9 = vpop.f32.mrf.mxu2 }
 0xb9e   :  { %1611 = vrot.lane.b32.xlu2 %v1438_v7, %s2123_s6  ;;  %1619 = vrot.lane.b32.xlu1 %v1570_v9, %s2916_s9 }
 0xbf0   :  { %v1618_v18 = vpop.permute.xlu2 %1617 }
 0xbf8   :  { %v1602_v15 = vpop.permute.xlu0 %1601  ;;  %v1612_v25 = vpop.permute.xlu2 %1611 }
 0xbf9   :  { %v1623_v16 = vsel %vm216_vm8, %v1148_v1, %v1602_v15 }
 0xc00   :  { %v1610_v17 = vpop.permute.xlu1 %1609 }
 0xc01   :  { %v1625_v19 = vsel %vm766_vm9, %v1623_v16, %v1610_v17 }
 0xc02   :  { %v1627_v22 = vsel %vm769_vm10, %v1625_v19, %v1618_v18 }
 0xc03   :  { %1927 = vmatmul.msk.f32.vlgmr.msra.gmra.mxu0 %vm119_vm0, %v1627_v22 }
 0xc08   :  { %v1604_v23 = vpop.permute.xlu1 %1603 }
 0xc09   :  { %v1624_v0 = vsel %vm216_vm8, %v1174_v3, %v1604_v23 }
 0xc0a   :  { %v1626_v27 = vsel %vm766_vm9, %v1624_v0, %v1612_v25 }
 0xc10   :  { %v1620_v26 = vpop.permute.xlu1 %1619 }
 0xc11   :  { %v1628_v55 = vsel %vm769_vm10, %v1626_v27, %v1620_v26 }
 0xc12   :  { %1928 = vmatmul.msk.f32.gmra.mxu0 %vm119_vm0, %v1628_v55 }
 0xc80   :  { %v1652_v28 = vpop.f32.mrf.mxu0 }
 0xc81   :  { %v1658_v29 = vadd.f32 %v1652_v28, %v2521_v21  ;;  %v953_v28 = vld [vmem:[%s2857_s23 + $0x8] sm:$0xff] }
 0xc83   :  { %v2715_v30 = vadd.f32 %v1991_v2, %v1658_v29  ;;  %v952_v29 = vld [vmem:[%s2857_s23] sm:$0xff] }
 0xc85   :  { %v1665_v20 = vsel %vm119_vm0, %v2715_v30, 0.0 }
 0xc86   :  { %1666 = vadd.xlane.f32.xlu2 %v1665_v20  ;;  %v1994_v20 = vld [vmem:[%s2856_s22] ss:$0 sm:$0xff] }
 0xc8f   :  { %v1655_v31 = vpop.f32.mrf.mxu0 }
 0xc90   :  { %v1659_v32 = vadd.f32 %v1655_v31, %v2526_v24 }
 0xc92   :  { %v2720_v33 = vadd.f32 %v1991_v2, %v1659_v32  ;;  %v954_v2 = vld [vmem:[%s2857_s23 + $0x10] sm:$0xff] }
 0xc93   :  { %1772 = vmatpush.msrb.mxu1 %v954_v2 }
 0xc94   :  { %v1668_v35 = vsel %vm119_vm0, %v2720_v33, 0.0 }
 0xc95   :  { %1669 = vadd.xlane.f32.xlu0 %v1668_v35  ;;  %1773 = vmatpush.msrb.mxu1 %v953_v28 }
 0xc97   :  { %1774 = vmatpush.msrb.mxu1 %v952_v29 }
 0xcf9   :  { %v1667_v36 = vpop.xlane.xlu2 %1666 }
 0xcfa   :  { %v1671_v37 = vmul.f32 %v1667_v36, %v2286_v10 }
 0xcfc   :  { %v1673_v21 = vsub.f32 %v2715_v30, %v1671_v37 }
 0xcfe   :  { %v1675_v38 = vmul.f32 %v1673_v21, %v1673_v21 }
 0xd00   :  { %v1677_v39 = vsel %vm119_vm0, %v1675_v38, 0.0  ;;  %v1995_v38 = vld [vmem:[%s2858_s24] ss:$0 sm:$0xff] }
 0xd01   :  { %1678 = vadd.xlane.f32.xlu1 %v1677_v39 }
 0xd08   :  { %v1670_v40 = vpop.xlane.xlu0 %1669 }
 0xd09   :  { %v1672_v41 = vmul.f32 %v1670_v40, %v2286_v10 }
 0xd0b   :  { %v1674_v24 = vsub.f32 %v2720_v33, %v1672_v41 }
 0xd0d   :  { %v1676_v43 = vmul.f32 %v1674_v24, %v1674_v24 }
 0xd0f   :  { %v1680_v42 = vsel %vm119_vm0, %v1676_v43, 0.0 }
 0xd10   :  { %1681 = vadd.xlane.f32.xlu2 %v1680_v42 }
 0xd28   :  { %1575 = vrot.lane.b32.xlu2 %v2662_v47, %s2915_s7 }
 0xd74   :  { %v1679_v47 = vpop.xlane.xlu1 %1678 }
 0xd75   :  { %v1683_v50 = vmul.f32 %v1679_v47, %v2286_v10 }
 0xd77   :  { %v1685_v51 = vadd.f32 1e-05, %v1683_v50 }
 0xd79   :  { %2076 = vrsqrt.f32 %v1685_v51  ;;  %vm1693_vm13 = vweird.f32 %v1685_v51 }
 0xd7f   :  { %v2077_v52 = vpop.eup %2076 }
 0xd80   :  { %v1688_v53 = vmul.f32 %v2077_v52, %v1685_v51  ;;  %vm1694_vm12 = vweird.f32 %v2077_v52 }
 0xd81   :  { %vm1695_vm14 = vmor %vm1693_vm13, %vm1694_vm12 }
 0xd82   :  { %v1689_v60 = vmul.f32 %v2077_v52, %v1688_v53 }
 0xd83   :  { %v1682_v1 = vpop.xlane.xlu2 %1681 }
 0xd84   :  { %v1690_v3 = vmul.f32 0.5, %v1689_v60  ;;  %v1684_v4 = vmul.f32 %v1682_v1, %v2286_v10 }
 0xd86   :  { %v1691_v6 = vsub.f32 1.5, %v1690_v3  ;;  %v1686_v7 = vadd.f32 1e-05, %v1684_v4 }
 0xd88   :  { %v1692_v9 = vmul.f32 %v2077_v52, %v1691_v6  ;;  %2078 = vrsqrt.f32 %v1686_v7  ;;  %vm1703_vm1 = vweird.f32 %v1686_v7 }
 0xd8a   :  { %v1696_v12 = vsel %vm1695_vm14, %v2077_v52, %v1692_v9 }
 0xd8b   :  { %v1707_v13 = vmul.f32 %v1696_v12, %v1673_v21 }
 0xd8d   :  { %v1712_v15 = vmul.f32 %v1992_v11, %v1707_v13  ;;  %v1996_v13 = vld [vmem:[%s2859_s25] ss:$0 sm:$0xff] }
 0xd8e   :  { %v2079_v16 = vpop.eup %2078 }
 0xd8f   :  { %v1698_v17 = vmul.f32 %v2079_v16, %v1686_v7  ;;  %v1717_v18 = vadd.f32 %v1993_v14, %v1712_v15  ;;  %vm1704_vm15 = vweird.f32 %v2079_v16 }
 0xd90   :  { %vm1705_vm3 = vmor %vm1703_vm1, %vm1704_vm15 }
 0xd91   :  { %v1699_v19 = vmul.f32 %v2079_v16, %v1698_v17  ;;  %1929 = vmatmul.msk.f32.vlgmr.msrb.gmra.mxu3 %vm119_vm0, %v1717_v18 }
 0xd93   :  { %v1700_v22 = vmul.f32 0.5, %v1699_v19 }
 0xd95   :  { %v1701_v23 = vsub.f32 1.5, %v1700_v22 }
 0xd97   :  { %v1702_v0 = vmul.f32 %v2079_v16, %v1701_v23 }
 0xd99   :  { %v1706_v25 = vsel %vm1705_vm3, %v2079_v16, %v1702_v0  ;;  %v1997_v16 = vld [vmem:[%s2860_s26] ss:$0 sm:$0xff] }
 0xd9a   :  { %v1708_v26 = vmul.f32 %v1706_v25, %v1674_v24 }
 0xd9c   :  { %v1713_v27 = vmul.f32 %v1992_v11, %v1708_v26 }
 0xd9e   :  { %v1718_v55 = vadd.f32 %v1993_v14, %v1713_v27 }
 0xda0   :  { %1930 = vmatmul.msk.f32.gmra.mxu3 %vm119_vm0, %v1718_v55 }
 0xe14   :  { %v1745_v31 = vpop.f32.mrf.mxu3 }
 0xe15   :  { %v1746_v32 = vadd.f32 %v1994_v20, %v1745_v31 }
 0xe17   :  { %v1751_v35 = vmax.f32 %v1746_v32, 0.0 }
 0xe19   :  { %1931 = vmatmul.msk.f32.vlgmr.msrb.gmra.mxu1 %vm896_vm2, %v1751_v35 }
 0xe23   :  { %v1748_v36 = vpop.f32.mrf.mxu3 }
 0xe24   :  { %v1749_v37 = vadd.f32 %v1994_v20, %v1748_v36 }
 0xe26   :  { %v1752_v21 = vmax.f32 %v1749_v37, 0.0 }
 0xe28   :  { %1932 = vmatmul.msk.f32.gmra.mxu1 %vm896_vm2, %v1752_v21 }
 0xe96   :  { %v1776_v39 = vpop.f32.mrf.mxu1 }
 0xe97   :  { %v1782_v40 = vadd.f32 %v1776_v39, %v2715_v30 }
 0xe99   :  { %v1787_v41 = vadd.f32 %v1995_v38, %v1782_v40 }
 0xe9b   :  { %v1791_v24 = vsel %vm119_vm0, %v1787_v41, 0.0 }
 0xe9c   :  { %1792 = vadd.xlane.f32.xlu0 %v1791_v24 }
 0xea5   :  { %v1779_v43 = vpop.f32.mrf.mxu1 }
 0xea6   :  { %v1783_v42 = vadd.f32 %v1779_v43, %v2720_v33 }
 0xea8   :  { %v1788_v44 = vadd.f32 %v1995_v38, %v1783_v42 }
 0xeaa   :  { %v1794_v45 = vsel %vm119_vm0, %v1788_v44, 0.0 }
 0xeab   :  { %1795 = vadd.xlane.f32.xlu1 %v1794_v45 }
 0xeb0   :  { %1579 = vrot.lane.b32.xlu0 %v2671_v58, %s2123_s6 }
 0xec4   :  { %1573 = vrot.lane.b32.xlu1 %v2659_v46, %s2915_s7  ;;  %v1576_v46 = vpop.permute.xlu2 %1575 }
 0xec5   :  { %v1592_v25 = vsel %vm216_vm8, %v2654_v34, %v1576_v46 }
 0xecc   :  { %1587 = vrot.lane.b32.xlu1 %v2679_v63, %s2916_s9 }
 0xf0f   :  { %v1793_v30 = vpop.xlane.xlu0 %1792 }
 0xf10   :  { %v1797_v48 = vmul.f32 %v1793_v30, %v2286_v10 }
 0xf12   :  { %v1799_v49 = vsub.f32 %v1787_v41, %v1797_v48 }
 0xf14   :  { %v1801_v47 = vmul.f32 %v1799_v49, %v1799_v49 }
 0xf16   :  { %v1803_v33 = vsel %vm119_vm0, %v1801_v47, 0.0 }
 0xf17   :  { %1804 = vadd.xlane.f32.xlu2 %v1803_v33 }
 0xf1e   :  { %v1796_v50 = vpop.xlane.xlu1 %1795 }
 0xf1f   :  { %v1798_v51 = vmul.f32 %v1796_v50, %v2286_v10 }
 0xf21   :  { %v1800_v52 = vsub.f32 %v1788_v44, %v1798_v51 }
 0xf22   :  { %v1580_v1 = vpop.permute.xlu0 %1579 }
 0xf23   :  { %v1802_v53 = vmul.f32 %v1800_v52, %v1800_v52 }
 0xf25   :  { %v1806_v58 = vsel %vm119_vm0, %v1802_v53, 0.0 }
 0xf26   :  { %1807 = vadd.xlane.f32.xlu0 %v1806_v58 }
 0xf2f   :  { %1585 = vrot.lane.b32.xlu2 %v2677_v62, %s2916_s9 }
 0xf36   :  { %v1574_v59 = vpop.permute.xlu1 %1573 }
 0xf37   :  { %v1591_v61 = vsel %vm216_vm8, %v2650_v57, %v1574_v59 }
 0xf38   :  { %v1593_v4 = vsel %vm766_vm9, %v1591_v61, %v1580_v1 }
 0xf3a   :  { %1581 = vrot.lane.b32.xlu0 %v2669_v56, %s2123_s6 }
 0xf3e   :  { %v1588_v27 = vpop.permute.xlu1 %1587 }
 0xf8a   :  { %v1805_v63 = vpop.xlane.xlu2 %1804 }
 0xf8b   :  { %v1809_v54 = vmul.f32 %v1805_v63, %v2286_v10 }
 0xf8d   :  { %v1811_v60 = vadd.f32 1e-05, %v1809_v54 }
 0xf8f   :  { %2080 = vrsqrt.f32 %v1811_v60  ;;  %vm1819_vm4 = vweird.f32 %v1811_v60 }
 0xf92   :  { %v1586_v3 = vpop.permute.xlu2 %1585 }
 0xf93   :  { %v1595_v5 = vsel %vm769_vm10, %v1593_v4, %v1586_v3 }
 0xf94   :  { %1597 = vst.msk [vmem:[%s2862_s28] sm:$0xff] %vm119_vm0, %v1595_v5 }
 0xf95   :  { %v2081_v56 = vpop.eup %2080 }
 0xf96   :  { %v1814_v62 = vmul.f32 %v2081_v56, %v1811_v60  ;;  %vm1820_vm2 = vweird.f32 %v2081_v56 }
 0xf97   :  { %vm1821_vm5 = vmor %vm1819_vm4, %vm1820_vm2 }
 0xf98   :  { %v1815_v6 = vmul.f32 %v2081_v56, %v1814_v62 }
 0xf99   :  { %v1808_v7 = vpop.xlane.xlu0 %1807 }
 0xf9a   :  { %v1816_v8 = vmul.f32 0.5, %v1815_v6  ;;  %v1810_v9 = vmul.f32 %v1808_v7, %v2286_v10 }
 0xf9c   :  { %v1817_v57 = vsub.f32 1.5, %v1816_v8  ;;  %v1812_v11 = vadd.f32 1e-05, %v1810_v9 }
 0xf9e   :  { %v1818_v12 = vmul.f32 %v2081_v56, %v1817_v57  ;;  %2082 = vrsqrt.f32 %v1812_v11  ;;  %vm1829_vm7 = vweird.f32 %v1812_v11 }
 0xfa0   :  { %v1822_v14 = vsel %vm1821_vm5, %v2081_v56, %v1818_v12 }
 0xfa1   :  { %v1833_v15 = vmul.f32 %v1822_v14, %v1799_v49 }
 0xfa3   :  { %v1838_v17 = vmul.f32 %v1996_v13, %v1833_v15 }
 0xfa4   :  { %v2083_v18 = vpop.eup %2082 }
 0xfa5   :  { %v1824_v10 = vmul.f32 %v2083_v18, %v1812_v11  ;;  %v1843_v19 = vadd.f32 %v1997_v16, %v1838_v17  ;;  %vm1830_vm6 = vweird.f32 %v2083_v18 }
 0xfa6   :  { %vm1831_vm11 = vmor %vm1829_vm7, %vm1830_vm6 }
 0xfa7   :  { %v1825_v22 = vmul.f32 %v2083_v18, %v1824_v10  ;;  %1845 = vst.msk [vmem:[#allocation2] sm:$0xff] %vm119_vm0, %v1843_v19 }
 0xfa9   :  { %v1826_v23 = vmul.f32 0.5, %v1825_v22 }
 0xfab   :  { %v1827_v0 = vsub.f32 1.5, %v1826_v23 }
 0xfac   :  { %v1582_v26 = vpop.permute.xlu0 %1581 }
 0xfad   :  { %v1828_v55 = vmul.f32 %v2083_v18, %v1827_v0  ;;  %v1594_v2 = vsel %vm766_vm9, %v1592_v25, %v1582_v26 }
 0xfae   :  { %v1596_v28 = vsel %vm769_vm10, %v1594_v2, %v1588_v27 }
 0xfaf   :  { %v1832_v29 = vsel %vm1831_vm11, %v2083_v18, %v1828_v55  ;;  %1598 = vst.msk [vmem:[%s2862_s28 + $0x8] sm:$0xff] %vm119_vm0, %v1596_v28 }
 0xfb0   :  { %v1834_v20 = vmul.f32 %v1832_v29, %v1800_v52 }
 0xfb2   :  { %v1839_v34 = vmul.f32 %v1996_v13, %v1834_v20 }
 0xfb4   :  { %v1844_v31 = vadd.f32 %v1997_v16, %v1839_v34 }
 0xfb6   :  { %1846 = vst.msk [vmem:[#allocation2 + $0x8] sm:$0xff] %vm119_vm0, %v1844_v31 }
 0xfb7   :  { %1859 = dma.vmem_to_hbm [thread:$0]  %s1852_s21, 256, %s1854_s17, [#allocation3], %s2126_s15, %s2126_s15, %s2915_s7  }
 0xfb8   :  { %2108 = dma.done.wait [#allocation3], 256  }
 0xfb9   :  { %2109 = vsyncadd [#allocation3], 4294967040 }
 0xfba   :  { %1868 = vsyncpa [#allocation3], 1 }

</bundles_post_ra>
